<compile_context>
chip_gen: v7x
topology: tpu7x:2x2x1
jax: 0.10.0
libtpu: 0.0.40
codegen_flags: <defaults>
</compile_context>

<pallas_src>
import math
import functools

import jax
import jax.numpy as jnp
from jax import lax
from jax.experimental import pallas as pl
from jax.experimental.pallas import tpu as pltpu


# ----------------------------------------------------------------------------
# Pallas kernel: full Transformer stack (grid iterates over layers)
# ----------------------------------------------------------------------------
def make_transformer_kernel(num_heads: int):
    def kernel(x_ref, mem_ref, sbias_ref, cbias_ref,
               ln_ref, attw_ref, w1_ref, w2_ref,
               out_ref, xacc_ref):
        layer = pl.program_id(0)
        last = pl.num_programs(0) - 1

        # Load the (pos-embedded) input once; the activation lives in VMEM
        # scratch across all layer grid steps.
        @pl.when(layer == 0)
        def _():
            xacc_ref[...] = x_ref[...]

        x = xacc_ref[...]          # (B*T, D)
        mem = mem_ref[...]         # (B*S, D)
        D = x.shape[-1]
        hd = D // num_heads

        ln = ln_ref[0]             # (6, D): n1w,n1b,ncw,ncb,n2w,n2b
        attw = attw_ref[0]         # (8, D, D): wq,wk,wv,wo, cwq,cwk,cwv,cwo
        sbias = sbias_ref[...]     # (B*T, B*T) additive causal+block-diag bias
        cbias = cbias_ref[...]     # (B*T, B*S) additive block-diag bias

        def layernorm(z, w, b):
            mu = jnp.mean(z, axis=-1, keepdims=True)
            zc = z - mu
            var = jnp.mean(zc * zc, axis=-1, keepdims=True)
            return zc * lax.rsqrt(var + 1e-5) * w + b

        def attention(xq, xkv, wq, wk, wv, wo, bias):
            # 1/sqrt(hd) is folded into wq at parameter-build time.
            q = jnp.dot(xq, wq, preferred_element_type=jnp.float32)   # (Nq, D)
            k = jnp.dot(xkv, wk, preferred_element_type=jnp.float32)  # (Nk, D)
            v = jnp.dot(xkv, wv, preferred_element_type=jnp.float32)  # (Nk, D)
            acc = None
            for h in range(num_heads):      # short static unroll over heads
                s0, s1 = h * hd, (h + 1) * hd
                s = lax.dot_general(q[:, s0:s1], k[:, s0:s1],
                                    (((1,), (1,)), ((), ())),
                                    preferred_element_type=jnp.float32)
                s = s + bias                 # mask precomputed in the wrapper
                m = jnp.max(s, axis=-1, keepdims=True)
                p = jnp.exp(s - m)
                linv = pl.reciprocal(jnp.sum(p, axis=-1, keepdims=True),
                                     approx=True)
                oh = jnp.dot(p, v[:, s0:s1],
                             preferred_element_type=jnp.float32) * linv
                # Fold the per-head slice of the output projection here and
                # sum (no lane-wise concatenate of head outputs).
                contrib = jnp.dot(oh, wo[s0:s1, :],
                                  preferred_element_type=jnp.float32)
                acc = contrib if acc is None else acc + contrib
            return acc

        # --- causal self-attention block ---
        x_ = layernorm(x, ln[0:1], ln[1:2])
        x = x + attention(x_, x_, attw[0], attw[1], attw[2], attw[3], sbias)

        # --- cross-attention block (keys/values from memory) ---
        x_ = layernorm(x, ln[2:3], ln[3:4])
        x = x + attention(x_, mem, attw[4], attw[5], attw[6], attw[7], cbias)

        # --- feed-forward block (exact erf GELU, matching F.gelu default) ---
        x_ = layernorm(x, ln[4:5], ln[5:6])
        h1 = jnp.dot(x_, w1_ref[0], preferred_element_type=jnp.float32)
        h1 = 0.5 * h1 * (1.0 + lax.erf(h1 * (1.0 / math.sqrt(2.0))))
        x = x + jnp.dot(h1, w2_ref[0], preferred_element_type=jnp.float32)

        xacc_ref[...] = x

        # Constant out block index -> buffer is resident; write HBM once.
        @pl.when(layer == last)
        def _():
            out_ref[...] = x

    return kernel


# ----------------------------------------------------------------------------
# Wrapper
# ----------------------------------------------------------------------------
def build_attention_biases(B, T, S, dtype=jnp.float32):
    """Additive biases (0 = attend, -1e30 = masked) for batch-fused attention."""
    neg = jnp.asarray(-1e30, dtype)
    zero = jnp.asarray(0.0, dtype)
    t = jnp.arange(T)
    b = jnp.arange(B)
    rb = jnp.repeat(b, T)                         # (B*T,) batch id of each row
    rt = jnp.tile(t, B)                           # (B*T,) time id of each row
    same_b = rb[:, None] == rb[None, :]
    causal = rt[None, :] <= rt[:, None]
    self_bias = jnp.where(same_b & causal, zero, neg)
    cb = jnp.repeat(b, S)                         # (B*S,) batch id of mem rows
    cross_bias = jnp.where(rb[:, None] == cb[None, :], zero, neg)
    return self_bias.astype(dtype), cross_bias.astype(dtype)


def transformer_forward(x, memory, params, num_heads,
                        rotary_emb=False, memory_key_padding_mask=None):
    # TODO(synk): rotary_emb path not implemented (RotaryEmbedding class is not
    # provided in the reference; default rotary_emb=False is the exercised path).
    del memory_key_padding_mask  # unused by the reference flash_attention too
    if not rotary_emb:
        x = pos_embed(x)

    B, T, D = x.shape
    S = memory.shape[1]
    depth = params["ln"].shape[0]
    FF = params["w1"].shape[-1]

    x2 = x.reshape(B * T, D)
    mem2 = memory.reshape(B * S, D)
    self_bias, cross_bias = build_attention_biases(B, T, S, x2.dtype)

    out2 = pl.pallas_call(
        make_transformer_kernel(num_heads),
        out_shape=jax.ShapeDtypeStruct((B * T, D), jnp.float32),
        grid=(depth,),
        in_specs=[
            pl.BlockSpec((B * T, D), lambda l: (0, 0)),         # x (pos-embedded)
            pl.BlockSpec((B * S, D), lambda l: (0, 0)),         # memory
            pl.BlockSpec((B * T, B * T), lambda l: (0, 0)),     # self-attn bias
            pl.BlockSpec((B * T, B * S), lambda l: (0, 0)),     # cross-attn bias
            pl.BlockSpec((1, 6, D), lambda l: (l, 0, 0)),       # LN params
            pl.BlockSpec((1, 8, D, D), lambda l: (l, 0, 0, 0)), # attn weights
            pl.BlockSpec((1, D, FF), lambda l: (l, 0, 0)),      # w1
            pl.BlockSpec((1, FF, D), lambda l: (l, 0, 0)),      # w2
        ],
        out_specs=pl.BlockSpec((B * T, D), lambda l: (0, 0)),
        scratch_shapes=[pltpu.VMEM((B * T, D), jnp.float32)],   # resident activation
        compiler_params=pltpu.CompilerParams(
            dimension_semantics=("arbitrary",)),                # layers are serial
    )(x2, mem2, self_bias, cross_bias,
      params["ln"], params["attw"], params["w1"], params["w2"])

    return out2.reshape(B, T, D)


# ----------------------------------------------------------------------------
# Plain-JAX glue: positional embedding + parameter init
# ----------------------------------------------------------------------------
def pos_embed(x):
    # matches create_sin_embedding(torch.arange(T).view(1,-1,1), dim)
    B, T, D = x.shape
    half = D // 2
    denom = max(half - 1, 1)
    positions = jnp.arange(T, dtype=x.dtype).reshape(1, T, 1)
    adim = jnp.arange(half, dtype=x.dtype).reshape(1, 1, half)
    phase = positions / (10000.0 ** (adim / denom))
    emb = jnp.concatenate([jnp.cos(phase), jnp.sin(phase)], axis=-1)
    return x + emb


def init_params(key, depth, dim, ff_dim, num_heads):
    """Stacked per-layer parameters, pre-transposed so projections are x @ W."""
    hd = dim // num_heads
    scale = 1.0 / math.sqrt(hd)      # SDPA softmax scale, folded into Wq
    bound = 1.0 / math.sqrt(dim)     # kaiming_uniform(a=sqrt(5)) -> U(-1/sqrt(fan_in), ..)
    b1 = 1.0 / math.sqrt(dim)
    b2 = 1.0 / math.sqrt(ff_dim)

    ln_l, attw_l, w1_l, w2_l = [], [], [], []
    for k in jax.random.split(key, depth):
        k1, k2, k3, k4, k5, k6 = jax.random.split(k, 6)
        sa_in = jax.random.uniform(k1, (3 * dim, dim), jnp.float32, -bound, bound)
        sa_out = jax.random.uniform(k2, (dim, dim), jnp.float32, -bound, bound)
        ca_in = jax.random.uniform(k3, (3 * dim, dim), jnp.float32, -bound, bound)
        ca_out = jax.random.uniform(k4, (dim, dim), jnp.float32, -bound, bound)
        # pre-transpose to (in, out); fold 1/sqrt(hd) into the Q projections
        attw = jnp.stack([
            sa_in[:dim].T * scale, sa_in[dim:2 * dim].T, sa_in[2 * dim:].T, sa_out.T,
            ca_in[:dim].T * scale, ca_in[dim:2 * dim].T, ca_in[2 * dim:].T, ca_out.T,
        ], axis=0)
        # LayerNorm defaults: weight=1, bias=0 (order: n1w,n1b,ncw,ncb,n2w,n2b)
        ln = jnp.stack([jnp.ones((dim,)), jnp.zeros((dim,)),
                        jnp.ones((dim,)), jnp.zeros((dim,)),
                        jnp.ones((dim,)), jnp.zeros((dim,))], axis=0)
        w1 = jax.random.uniform(k5, (ff_dim, dim), jnp.float32, -b1, b1).T
        w2 = jax.random.uniform(k6, (dim, ff_dim), jnp.float32, -b2, b2).T
        ln_l.append(ln.astype(jnp.float32))
        attw_l.append(attw)
        w1_l.append(w1)
        w2_l.append(w2)

    return {
        "ln": jnp.stack(ln_l),       # (depth, 6, D)
        "attw": jnp.stack(attw_l),   # (depth, 8, D, D)
        "w1": jnp.stack(w1_l),       # (depth, D, FF)
        "w2": jnp.stack(w2_l),       # (depth, FF, D)
    }


# ----------------------------------------------------------------------------
# Main
# ----------------------------------------------------------------------------
if __name__ == "__main__":
    B, T, S = 2, 8, 8
    DIM, HEADS, FF_DIM, DEPTH = 32, 4, 64, 2

    key = jax.random.PRNGKey(0)
    kx, kmem, kp = jax.random.split(key, 3)
    x = jax.random.normal(kx, (B, T, DIM), jnp.float32)
    memory = jax.random.normal(kmem, (B, S, DIM), jnp.float32)
    params = init_params(kp, DEPTH, DIM, FF_DIM, HEADS)

    fwd = jax.jit(functools.partial(transformer_forward, num_heads=HEADS,
                                    rotary_emb=False))
    out = fwd(x, memory, params)
    jax.block_until_ready(out)

    assert out.shape == (B, T, DIM)
    assert bool(jnp.all(jnp.isfinite(out)))
    print("KERNEL_OK")
</pallas_src>

<mosaic_0001>
module attributes {stable_mosaic.version = 11 : i64} {
  func.func @kernel(%arg0: i32, %arg1: memref<16x32xf32, #tpu.memory_space<vmem>>, %arg2: memref<16x32xf32, #tpu.memory_space<vmem>>, %arg3: memref<16x16xf32, #tpu.memory_space<vmem>>, %arg4: memref<16x16xf32, #tpu.memory_space<vmem>>, %arg5: memref<1x6x32xf32, #tpu.memory_space<vmem>>, %arg6: memref<1x8x32x32xf32, #tpu.memory_space<vmem>>, %arg7: memref<1x32x64xf32, #tpu.memory_space<vmem>>, %arg8: memref<1x64x32xf32, #tpu.memory_space<vmem>>, %arg9: memref<16x32xf32, #tpu.memory_space<vmem>>, %arg10: memref<16x32xf32, #tpu.memory_space<vmem>>) attributes {dimension_semantics = [#tpu.dimension_semantics<arbitrary>], iteration_bounds = array<i64: 2>, scalar_prefetch = 0 : i64, scratch_operands = 1 : i64, tpu.core_type = #tpu.core_type<tc>, window_params = [{pipeline_mode = #tpu.pipeline_mode<synchronous>, transform_indices = @transform_0, window_bounds = array<i64: 16, 32>}, {pipeline_mode = #tpu.pipeline_mode<synchronous>, transform_indices = @transform_1, window_bounds = array<i64: 16, 32>}, {pipeline_mode = #tpu.pipeline_mode<synchronous>, transform_indices = @transform_2, window_bounds = array<i64: 16, 16>}, {pipeline_mode = #tpu.pipeline_mode<synchronous>, transform_indices = @transform_3, window_bounds = array<i64: 16, 16>}, {transform_indices = @transform_4, window_bounds = array<i64: 1, 6, 32>}, {transform_indices = @transform_5, window_bounds = array<i64: 1, 8, 32, 32>}, {transform_indices = @transform_6, window_bounds = array<i64: 1, 32, 64>}, {transform_indices = @transform_7, window_bounds = array<i64: 1, 64, 32>}, {pipeline_mode = #tpu.pipeline_mode<synchronous>, transform_indices = @transform_8, window_bounds = array<i64: 16, 32>}]} {
    %c0_i32 = arith.constant 0 : i32
    %0 = arith.cmpi eq, %arg0, %c0_i32 : i32
    %1 = arith.extui %0 : i1 to i32
    %c0_i32_0 = arith.constant 0 : i32
    %2 = arith.cmpi ne, %1, %c0_i32_0 : i32
    scf.if %2 {
      %c0_89 = arith.constant 0 : index
      %c0_90 = arith.constant 0 : index
      %270 = vector.load %arg1[%c0_89, %c0_90] : memref<16x32xf32, #tpu.memory_space<vmem>>, vector<16x32xf32>
      %c0_91 = arith.constant 0 : index
      %c0_92 = arith.constant 0 : index
      %271 = vector.load %arg10[%c0_91, %c0_92] : memref<16x32xf32, #tpu.memory_space<vmem>>, vector<16x32xf32>
      tpu.vector_store %arg10[%c0_91, %c0_92], %270 {strides = array<i32>} : memref<16x32xf32, #tpu.memory_space<vmem>>, vector<16x32xf32>,
    } else {
    }
    %c0 = arith.constant 0 : index
    %c0_1 = arith.constant 0 : index
    %3 = vector.load %arg10[%c0, %c0_1] : memref<16x32xf32, #tpu.memory_space<vmem>>, vector<16x32xf32>
    %c0_2 = arith.constant 0 : index
    %c0_3 = arith.constant 0 : index
    %4 = vector.load %arg2[%c0_2, %c0_3] : memref<16x32xf32, #tpu.memory_space<vmem>>, vector<16x32xf32>
    %c0_4 = arith.constant 0 : index
    %c0_5 = arith.constant 0 : index
    %c0_6 = arith.constant 0 : index
    %5 = vector.load %arg5[%c0_4, %c0_5, %c0_6] : memref<1x6x32xf32, #tpu.memory_space<vmem>>, vector<1x6x32xf32>
    %6 = vector.shape_cast %5 : vector<1x6x32xf32> to vector<6x32xf32>
    %c0_7 = arith.constant 0 : index
    %c0_8 = arith.constant 0 : index
    %c0_9 = arith.constant 0 : index
    %c0_10 = arith.constant 0 : index
    %7 = vector.load %arg6[%c0_7, %c0_8, %c0_9, %c0_10] : memref<1x8x32x32xf32, #tpu.memory_space<vmem>>, vector<1x8x32x32xf32>
    %8 = vector.shape_cast %7 : vector<1x8x32x32xf32> to vector<8x32x32xf32>
    %c0_11 = arith.constant 0 : index
    %c0_12 = arith.constant 0 : index
    %9 = vector.load %arg3[%c0_11, %c0_12] : memref<16x16xf32, #tpu.memory_space<vmem>>, vector<16x16xf32>
    %c0_13 = arith.constant 0 : index
    %c0_14 = arith.constant 0 : index
    %10 = vector.load %arg4[%c0_13, %c0_14] : memref<16x16xf32, #tpu.memory_space<vmem>>, vector<16x16xf32>
    %11 = vector.extract_strided_slice %6 {offsets = [0, 0], sizes = [1, 32], strides = [1, 1]} : vector<6x32xf32> to vector<1x32xf32>
    %12 = vector.extract_strided_slice %6 {offsets = [1, 0], sizes = [1, 32], strides = [1, 1]} : vector<6x32xf32> to vector<1x32xf32>
    %cst = arith.constant dense<0.000000e+00> : vector<16xf32>
    %13 = vector.multi_reduction <add>, %3, %cst [1] : vector<16x32xf32> to vector<16xf32>
    %14 = vector.shape_cast %13 : vector<16xf32> to vector<16x1xf32>
    %cst_15 = arith.constant 3.200000e+01 : f32
    %15 = vector.broadcast %cst_15 : f32 to vector<16x1xf32>
    %16 = arith.divf %14, %15 : vector<16x1xf32>
    %17 = vector.broadcast %16 : vector<16x1xf32> to vector<16x32xf32>
    %18 = arith.subf %3, %17 : vector<16x32xf32>
    %19 = arith.mulf %18, %18 : vector<16x32xf32>
    %cst_16 = arith.constant dense<0.000000e+00> : vector<16xf32>
    %20 = vector.multi_reduction <add>, %19, %cst_16 [1] : vector<16x32xf32> to vector<16xf32>
    %21 = vector.shape_cast %20 : vector<16xf32> to vector<16x1xf32>
    %cst_17 = arith.constant 3.200000e+01 : f32
    %22 = vector.broadcast %cst_17 : f32 to vector<16x1xf32>
    %23 = arith.divf %21, %22 : vector<16x1xf32>
    %cst_18 = arith.constant 9.99999974E-6 : f32
    %24 = vector.broadcast %cst_18 : f32 to vector<16x1xf32>
    %25 = arith.addf %23, %24 : vector<16x1xf32>
    %26 = math.rsqrt %25 : vector<16x1xf32>
    %27 = vector.broadcast %26 : vector<16x1xf32> to vector<16x32xf32>
    %28 = arith.mulf %18, %27 : vector<16x32xf32>
    %29 = vector.broadcast %11 : vector<1x32xf32> to vector<16x32xf32>
    %30 = arith.mulf %28, %29 : vector<16x32xf32>
    %31 = vector.broadcast %12 : vector<1x32xf32> to vector<16x32xf32>
    %32 = arith.addf %30, %31 : vector<16x32xf32>
    %33 = vector.extract_strided_slice %8 {offsets = [0, 0, 0], sizes = [1, 32, 32], strides = [1, 1, 1]} : vector<8x32x32xf32> to vector<1x32x32xf32>
    %34 = vector.shape_cast %33 : vector<1x32x32xf32> to vector<32x32xf32>
    %35 = vector.extract_strided_slice %8 {offsets = [1, 0, 0], sizes = [1, 32, 32], strides = [1, 1, 1]} : vector<8x32x32xf32> to vector<1x32x32xf32>
    %36 = vector.shape_cast %35 : vector<1x32x32xf32> to vector<32x32xf32>
    %37 = vector.extract_strided_slice %8 {offsets = [2, 0, 0], sizes = [1, 32, 32], strides = [1, 1, 1]} : vector<8x32x32xf32> to vector<1x32x32xf32>
    %38 = vector.shape_cast %37 : vector<1x32x32xf32> to vector<32x32xf32>
    %39 = vector.extract_strided_slice %8 {offsets = [3, 0, 0], sizes = [1, 32, 32], strides = [1, 1, 1]} : vector<8x32x32xf32> to vector<1x32x32xf32>
    %40 = vector.shape_cast %39 : vector<1x32x32xf32> to vector<32x32xf32>
    %cst_19 = arith.constant dense<0.000000e+00> : vector<16x32xf32>
    %41 = tpu.matmul %32, %34, %cst_19 {dimension_numbers = #tpu.dot_dimension_numbers<[1], [0], [0], [1], [0, 0, 1, 1], [], []>} : vector<16x32xf32>, vector<32x32xf32>, vector<16x32xf32> -> vector<16x32xf32>
    %cst_20 = arith.constant dense<0.000000e+00> : vector<16x32xf32>
    %42 = tpu.matmul %32, %36, %cst_20 {dimension_numbers = #tpu.dot_dimension_numbers<[1], [0], [0], [1], [0, 0, 1, 1], [], []>} : vector<16x32xf32>, vector<32x32xf32>, vector<16x32xf32> -> vector<16x32xf32>
    %cst_21 = arith.constant dense<0.000000e+00> : vector<16x32xf32>
    %43 = tpu.matmul %32, %38, %cst_21 {dimension_numbers = #tpu.dot_dimension_numbers<[1], [0], [0], [1], [0, 0, 1, 1], [], []>} : vector<16x32xf32>, vector<32x32xf32>, vector<16x32xf32> -> vector<16x32xf32>
    %44 = vector.extract_strided_slice %41 {offsets = [0, 0], sizes = [16, 8], strides = [1, 1]} : vector<16x32xf32> to vector<16x8xf32>
    %45 = vector.extract_strided_slice %42 {offsets = [0, 0], sizes = [16, 8], strides = [1, 1]} : vector<16x32xf32> to vector<16x8xf32>
    %cst_22 = arith.constant dense<0.000000e+00> : vector<16x16xf32>
    %46 = tpu.matmul %44, %45, %cst_22 {dimension_numbers = #tpu.dot_dimension_numbers<[1], [1], [0], [0], [0, 0, 1, 0], [], []>} : vector<16x8xf32>, vector<16x8xf32>, vector<16x16xf32> -> vector<16x16xf32>
    %47 = arith.addf %46, %9 : vector<16x16xf32>
    %cst_23 = arith.constant dense<0xFF800000> : vector<16xf32>
    %48 = vector.multi_reduction <maximumf>, %47, %cst_23 [1] : vector<16x16xf32> to vector<16xf32>
    %49 = vector.shape_cast %48 : vector<16xf32> to vector<16x1xf32>
    %50 = vector.broadcast %49 : vector<16x1xf32> to vector<16x16xf32>
    %51 = arith.subf %47, %50 : vector<16x16xf32>
    %52 = math.exp %51 : vector<16x16xf32>
    %cst_24 = arith.constant dense<0.000000e+00> : vector<16xf32>
    %53 = vector.multi_reduction <add>, %52, %cst_24 [1] : vector<16x16xf32> to vector<16xf32>
    %54 = vector.shape_cast %53 : vector<16xf32> to vector<16x1xf32>
    %55 = tpu.reciprocal %54 {approx = true} : vector<16x1xf32> -> vector<16x1xf32>
    %56 = vector.extract_strided_slice %43 {offsets = [0, 0], sizes = [16, 8], strides = [1, 1]} : vector<16x32xf32> to vector<16x8xf32>
    %cst_25 = arith.constant dense<0.000000e+00> : vector<16x8xf32>
    %57 = tpu.matmul %52, %56, %cst_25 {dimension_numbers = #tpu.dot_dimension_numbers<[1], [0], [0], [1], [0, 0, 1, 1], [], []>} : vector<16x16xf32>, vector<16x8xf32>, vector<16x8xf32> -> vector<16x8xf32>
    %58 = vector.broadcast %55 : vector<16x1xf32> to vector<16x8xf32>
    %59 = arith.mulf %57, %58 : vector<16x8xf32>
    %60 = vector.extract_strided_slice %40 {offsets = [0, 0], sizes = [8, 32], strides = [1, 1]} : vector<32x32xf32> to vector<8x32xf32>
    %cst_26 = arith.constant dense<0.000000e+00> : vector<16x32xf32>
    %61 = tpu.matmul %59, %60, %cst_26 {dimension_numbers = #tpu.dot_dimension_numbers<[1], [0], [0], [1], [0, 0, 1, 1], [], []>} : vector<16x8xf32>, vector<8x32xf32>, vector<16x32xf32> -> vector<16x32xf32>
    %62 = vector.extract_strided_slice %41 {offsets = [0, 8], sizes = [16, 8], strides = [1, 1]} : vector<16x32xf32> to vector<16x8xf32>
    %63 = vector.extract_strided_slice %42 {offsets = [0, 8], sizes = [16, 8], strides = [1, 1]} : vector<16x32xf32> to vector<16x8xf32>
    %cst_27 = arith.constant dense<0.000000e+00> : vector<16x16xf32>
    %64 = tpu.matmul %62, %63, %cst_27 {dimension_numbers = #tpu.dot_dimension_numbers<[1], [1], [0], [0], [0, 0, 1, 0], [], []>} : vector<16x8xf32>, vector<16x8xf32>, vector<16x16xf32> -> vector<16x16xf32>
    %65 = arith.addf %64, %9 : vector<16x16xf32>
    %cst_28 = arith.constant dense<0xFF800000> : vector<16xf32>
    %66 = vector.multi_reduction <maximumf>, %65, %cst_28 [1] : vector<16x16xf32> to vector<16xf32>
    %67 = vector.shape_cast %66 : vector<16xf32> to vector<16x1xf32>
    %68 = vector.broadcast %67 : vector<16x1xf32> to vector<16x16xf32>
    %69 = arith.subf %65, %68 : vector<16x16xf32>
    %70 = math.exp %69 : vector<16x16xf32>
    %cst_29 = arith.constant dense<0.000000e+00> : vector<16xf32>
    %71 = vector.multi_reduction <add>, %70, %cst_29 [1] : vector<16x16xf32> to vector<16xf32>
    %72 = vector.shape_cast %71 : vector<16xf32> to vector<16x1xf32>
    %73 = tpu.reciprocal %72 {approx = true} : vector<16x1xf32> -> vector<16x1xf32>
    %74 = vector.extract_strided_slice %43 {offsets = [0, 8], sizes = [16, 8], strides = [1, 1]} : vector<16x32xf32> to vector<16x8xf32>
    %cst_30 = arith.constant dense<0.000000e+00> : vector<16x8xf32>
    %75 = tpu.matmul %70, %74, %cst_30 {dimension_numbers = #tpu.dot_dimension_numbers<[1], [0], [0], [1], [0, 0, 1, 1], [], []>} : vector<16x16xf32>, vector<16x8xf32>, vector<16x8xf32> -> vector<16x8xf32>
    %76 = vector.broadcast %73 : vector<16x1xf32> to vector<16x8xf32>
    %77 = arith.mulf %75, %76 : vector<16x8xf32>
    %78 = vector.extract_strided_slice %40 {offsets = [8, 0], sizes = [8, 32], strides = [1, 1]} : vector<32x32xf32> to vector<8x32xf32>
    %cst_31 = arith.constant dense<0.000000e+00> : vector<16x32xf32>
    %79 = tpu.matmul %77, %78, %cst_31 {dimension_numbers = #tpu.dot_dimension_numbers<[1], [0], [0], [1], [0, 0, 1, 1], [], []>} : vector<16x8xf32>, vector<8x32xf32>, vector<16x32xf32> -> vector<16x32xf32>
    %80 = arith.addf %61, %79 : vector<16x32xf32>
    %81 = vector.extract_strided_slice %41 {offsets = [0, 16], sizes = [16, 8], strides = [1, 1]} : vector<16x32xf32> to vector<16x8xf32>
    %82 = vector.extract_strided_slice %42 {offsets = [0, 16], sizes = [16, 8], strides = [1, 1]} : vector<16x32xf32> to vector<16x8xf32>
    %cst_32 = arith.constant dense<0.000000e+00> : vector<16x16xf32>
    %83 = tpu.matmul %81, %82, %cst_32 {dimension_numbers = #tpu.dot_dimension_numbers<[1], [1], [0], [0], [0, 0, 1, 0], [], []>} : vector<16x8xf32>, vector<16x8xf32>, vector<16x16xf32> -> vector<16x16xf32>
    %84 = arith.addf %83, %9 : vector<16x16xf32>
    %cst_33 = arith.constant dense<0xFF800000> : vector<16xf32>
    %85 = vector.multi_reduction <maximumf>, %84, %cst_33 [1] : vector<16x16xf32> to vector<16xf32>
    %86 = vector.shape_cast %85 : vector<16xf32> to vector<16x1xf32>
    %87 = vector.broadcast %86 : vector<16x1xf32> to vector<16x16xf32>
    %88 = arith.subf %84, %87 : vector<16x16xf32>
    %89 = math.exp %88 : vector<16x16xf32>
    %cst_34 = arith.constant dense<0.000000e+00> : vector<16xf32>
    %90 = vector.multi_reduction <add>, %89, %cst_34 [1] : vector<16x16xf32> to vector<16xf32>
    %91 = vector.shape_cast %90 : vector<16xf32> to vector<16x1xf32>
    %92 = tpu.reciprocal %91 {approx = true} : vector<16x1xf32> -> vector<16x1xf32>
    %93 = vector.extract_strided_slice %43 {offsets = [0, 16], sizes = [16, 8], strides = [1, 1]} : vector<16x32xf32> to vector<16x8xf32>
    %cst_35 = arith.constant dense<0.000000e+00> : vector<16x8xf32>
    %94 = tpu.matmul %89, %93, %cst_35 {dimension_numbers = #tpu.dot_dimension_numbers<[1], [0], [0], [1], [0, 0, 1, 1], [], []>} : vector<16x16xf32>, vector<16x8xf32>, vector<16x8xf32> -> vector<16x8xf32>
    %95 = vector.broadcast %92 : vector<16x1xf32> to vector<16x8xf32>
    %96 = arith.mulf %94, %95 : vector<16x8xf32>
    %97 = vector.extract_strided_slice %40 {offsets = [16, 0], sizes = [8, 32], strides = [1, 1]} : vector<32x32xf32> to vector<8x32xf32>
    %cst_36 = arith.constant dense<0.000000e+00> : vector<16x32xf32>
    %98 = tpu.matmul %96, %97, %cst_36 {dimension_numbers = #tpu.dot_dimension_numbers<[1], [0], [0], [1], [0, 0, 1, 1], [], []>} : vector<16x8xf32>, vector<8x32xf32>, vector<16x32xf32> -> vector<16x32xf32>
    %99 = arith.addf %80, %98 : vector<16x32xf32>
    %100 = vector.extract_strided_slice %41 {offsets = [0, 24], sizes = [16, 8], strides = [1, 1]} : vector<16x32xf32> to vector<16x8xf32>
    %101 = vector.extract_strided_slice %42 {offsets = [0, 24], sizes = [16, 8], strides = [1, 1]} : vector<16x32xf32> to vector<16x8xf32>
    %cst_37 = arith.constant dense<0.000000e+00> : vector<16x16xf32>
    %102 = tpu.matmul %100, %101, %cst_37 {dimension_numbers = #tpu.dot_dimension_numbers<[1], [1], [0], [0], [0, 0, 1, 0], [], []>} : vector<16x8xf32>, vector<16x8xf32>, vector<16x16xf32> -> vector<16x16xf32>
    %103 = arith.addf %102, %9 : vector<16x16xf32>
    %cst_38 = arith.constant dense<0xFF800000> : vector<16xf32>
    %104 = vector.multi_reduction <maximumf>, %103, %cst_38 [1] : vector<16x16xf32> to vector<16xf32>
    %105 = vector.shape_cast %104 : vector<16xf32> to vector<16x1xf32>
    %106 = vector.broadcast %105 : vector<16x1xf32> to vector<16x16xf32>
    %107 = arith.subf %103, %106 : vector<16x16xf32>
    %108 = math.exp %107 : vector<16x16xf32>
    %cst_39 = arith.constant dense<0.000000e+00> : vector<16xf32>
    %109 = vector.multi_reduction <add>, %108, %cst_39 [1] : vector<16x16xf32> to vector<16xf32>
    %110 = vector.shape_cast %109 : vector<16xf32> to vector<16x1xf32>
    %111 = tpu.reciprocal %110 {approx = true} : vector<16x1xf32> -> vector<16x1xf32>
    %112 = vector.extract_strided_slice %43 {offsets = [0, 24], sizes = [16, 8], strides = [1, 1]} : vector<16x32xf32> to vector<16x8xf32>
    %cst_40 = arith.constant dense<0.000000e+00> : vector<16x8xf32>
    %113 = tpu.matmul %108, %112, %cst_40 {dimension_numbers = #tpu.dot_dimension_numbers<[1], [0], [0], [1], [0, 0, 1, 1], [], []>} : vector<16x16xf32>, vector<16x8xf32>, vector<16x8xf32> -> vector<16x8xf32>
    %114 = vector.broadcast %111 : vector<16x1xf32> to vector<16x8xf32>
    %115 = arith.mulf %113, %114 : vector<16x8xf32>
    %116 = vector.extract_strided_slice %40 {offsets = [24, 0], sizes = [8, 32], strides = [1, 1]} : vector<32x32xf32> to vector<8x32xf32>
    %cst_41 = arith.constant dense<0.000000e+00> : vector<16x32xf32>
    %117 = tpu.matmul %115, %116, %cst_41 {dimension_numbers = #tpu.dot_dimension_numbers<[1], [0], [0], [1], [0, 0, 1, 1], [], []>} : vector<16x8xf32>, vector<8x32xf32>, vector<16x32xf32> -> vector<16x32xf32>
    %118 = arith.addf %99, %117 : vector<16x32xf32>
    %119 = arith.addf %3, %118 : vector<16x32xf32>
    %120 = vector.extract_strided_slice %6 {offsets = [2, 0], sizes = [1, 32], strides = [1, 1]} : vector<6x32xf32> to vector<1x32xf32>
    %121 = vector.extract_strided_slice %6 {offsets = [3, 0], sizes = [1, 32], strides = [1, 1]} : vector<6x32xf32> to vector<1x32xf32>
    %cst_42 = arith.constant dense<0.000000e+00> : vector<16xf32>
    %122 = vector.multi_reduction <add>, %119, %cst_42 [1] : vector<16x32xf32> to vector<16xf32>
    %123 = vector.shape_cast %122 : vector<16xf32> to vector<16x1xf32>
    %cst_43 = arith.constant 3.200000e+01 : f32
    %124 = vector.broadcast %cst_43 : f32 to vector<16x1xf32>
    %125 = arith.divf %123, %124 : vector<16x1xf32>
    %126 = vector.broadcast %125 : vector<16x1xf32> to vector<16x32xf32>
    %127 = arith.subf %119, %126 : vector<16x32xf32>
    %128 = arith.mulf %127, %127 : vector<16x32xf32>
    %cst_44 = arith.constant dense<0.000000e+00> : vector<16xf32>
    %129 = vector.multi_reduction <add>, %128, %cst_44 [1] : vector<16x32xf32> to vector<16xf32>
    %130 = vector.shape_cast %129 : vector<16xf32> to vector<16x1xf32>
    %cst_45 = arith.constant 3.200000e+01 : f32
    %131 = vector.broadcast %cst_45 : f32 to vector<16x1xf32>
    %132 = arith.divf %130, %131 : vector<16x1xf32>
    %cst_46 = arith.constant 9.99999974E-6 : f32
    %133 = vector.broadcast %cst_46 : f32 to vector<16x1xf32>
    %134 = arith.addf %132, %133 : vector<16x1xf32>
    %135 = math.rsqrt %134 : vector<16x1xf32>
    %136 = vector.broadcast %135 : vector<16x1xf32> to vector<16x32xf32>
    %137 = arith.mulf %127, %136 : vector<16x32xf32>
    %138 = vector.broadcast %120 : vector<1x32xf32> to vector<16x32xf32>
    %139 = arith.mulf %137, %138 : vector<16x32xf32>
    %140 = vector.broadcast %121 : vector<1x32xf32> to vector<16x32xf32>
    %141 = arith.addf %139, %140 : vector<16x32xf32>
    %142 = vector.extract_strided_slice %8 {offsets = [4, 0, 0], sizes = [1, 32, 32], strides = [1, 1, 1]} : vector<8x32x32xf32> to vector<1x32x32xf32>
    %143 = vector.shape_cast %142 : vector<1x32x32xf32> to vector<32x32xf32>
    %144 = vector.extract_strided_slice %8 {offsets = [5, 0, 0], sizes = [1, 32, 32], strides = [1, 1, 1]} : vector<8x32x32xf32> to vector<1x32x32xf32>
    %145 = vector.shape_cast %144 : vector<1x32x32xf32> to vector<32x32xf32>
    %146 = vector.extract_strided_slice %8 {offsets = [6, 0, 0], sizes = [1, 32, 32], strides = [1, 1, 1]} : vector<8x32x32xf32> to vector<1x32x32xf32>
    %147 = vector.shape_cast %146 : vector<1x32x32xf32> to vector<32x32xf32>
    %148 = vector.extract_strided_slice %8 {offsets = [7, 0, 0], sizes = [1, 32, 32], strides = [1, 1, 1]} : vector<8x32x32xf32> to vector<1x32x32xf32>
    %149 = vector.shape_cast %148 : vector<1x32x32xf32> to vector<32x32xf32>
    %cst_47 = arith.constant dense<0.000000e+00> : vector<16x32xf32>
    %150 = tpu.matmul %141, %143, %cst_47 {dimension_numbers = #tpu.dot_dimension_numbers<[1], [0], [0], [1], [0, 0, 1, 1], [], []>} : vector<16x32xf32>, vector<32x32xf32>, vector<16x32xf32> -> vector<16x32xf32>
    %cst_48 = arith.constant dense<0.000000e+00> : vector<16x32xf32>
    %151 = tpu.matmul %4, %145, %cst_48 {dimension_numbers = #tpu.dot_dimension_numbers<[1], [0], [0], [1], [0, 0, 1, 1], [], []>} : vector<16x32xf32>, vector<32x32xf32>, vector<16x32xf32> -> vector<16x32xf32>
    %cst_49 = arith.constant dense<0.000000e+00> : vector<16x32xf32>
    %152 = tpu.matmul %4, %147, %cst_49 {dimension_numbers = #tpu.dot_dimension_numbers<[1], [0], [0], [1], [0, 0, 1, 1], [], []>} : vector<16x32xf32>, vector<32x32xf32>, vector<16x32xf32> -> vector<16x32xf32>
    %153 = vector.extract_strided_slice %150 {offsets = [0, 0], sizes = [16, 8], strides = [1, 1]} : vector<16x32xf32> to vector<16x8xf32>
    %154 = vector.extract_strided_slice %151 {offsets = [0, 0], sizes = [16, 8], strides = [1, 1]} : vector<16x32xf32> to vector<16x8xf32>
    %cst_50 = arith.constant dense<0.000000e+00> : vector<16x16xf32>
    %155 = tpu.matmul %153, %154, %cst_50 {dimension_numbers = #tpu.dot_dimension_numbers<[1], [1], [0], [0], [0, 0, 1, 0], [], []>} : vector<16x8xf32>, vector<16x8xf32>, vector<16x16xf32> -> vector<16x16xf32>
    %156 = arith.addf %155, %10 : vector<16x16xf32>
    %cst_51 = arith.constant dense<0xFF800000> : vector<16xf32>
    %157 = vector.multi_reduction <maximumf>, %156, %cst_51 [1] : vector<16x16xf32> to vector<16xf32>
    %158 = vector.shape_cast %157 : vector<16xf32> to vector<16x1xf32>
    %159 = vector.broadcast %158 : vector<16x1xf32> to vector<16x16xf32>
    %160 = arith.subf %156, %159 : vector<16x16xf32>
    %161 = math.exp %160 : vector<16x16xf32>
    %cst_52 = arith.constant dense<0.000000e+00> : vector<16xf32>
    %162 = vector.multi_reduction <add>, %161, %cst_52 [1] : vector<16x16xf32> to vector<16xf32>
    %163 = vector.shape_cast %162 : vector<16xf32> to vector<16x1xf32>
    %164 = tpu.reciprocal %163 {approx = true} : vector<16x1xf32> -> vector<16x1xf32>
    %165 = vector.extract_strided_slice %152 {offsets = [0, 0], sizes = [16, 8], strides = [1, 1]} : vector<16x32xf32> to vector<16x8xf32>
    %cst_53 = arith.constant dense<0.000000e+00> : vector<16x8xf32>
    %166 = tpu.matmul %161, %165, %cst_53 {dimension_numbers = #tpu.dot_dimension_numbers<[1], [0], [0], [1], [0, 0, 1, 1], [], []>} : vector<16x16xf32>, vector<16x8xf32>, vector<16x8xf32> -> vector<16x8xf32>
    %167 = vector.broadcast %164 : vector<16x1xf32> to vector<16x8xf32>
    %168 = arith.mulf %166, %167 : vector<16x8xf32>
    %169 = vector.extract_strided_slice %149 {offsets = [0, 0], sizes = [8, 32], strides = [1, 1]} : vector<32x32xf32> to vector<8x32xf32>
    %cst_54 = arith.constant dense<0.000000e+00> : vector<16x32xf32>
    %170 = tpu.matmul %168, %169, %cst_54 {dimension_numbers = #tpu.dot_dimension_numbers<[1], [0], [0], [1], [0, 0, 1, 1], [], []>} : vector<16x8xf32>, vector<8x32xf32>, vector<16x32xf32> -> vector<16x32xf32>
    %171 = vector.extract_strided_slice %150 {offsets = [0, 8], sizes = [16, 8], strides = [1, 1]} : vector<16x32xf32> to vector<16x8xf32>
    %172 = vector.extract_strided_slice %151 {offsets = [0, 8], sizes = [16, 8], strides = [1, 1]} : vector<16x32xf32> to vector<16x8xf32>
    %cst_55 = arith.constant dense<0.000000e+00> : vector<16x16xf32>
    %173 = tpu.matmul %171, %172, %cst_55 {dimension_numbers = #tpu.dot_dimension_numbers<[1], [1], [0], [0], [0, 0, 1, 0], [], []>} : vector<16x8xf32>, vector<16x8xf32>, vector<16x16xf32> -> vector<16x16xf32>
    %174 = arith.addf %173, %10 : vector<16x16xf32>
    %cst_56 = arith.constant dense<0xFF800000> : vector<16xf32>
    %175 = vector.multi_reduction <maximumf>, %174, %cst_56 [1] : vector<16x16xf32> to vector<16xf32>
    %176 = vector.shape_cast %175 : vector<16xf32> to vector<16x1xf32>
    %177 = vector.broadcast %176 : vector<16x1xf32> to vector<16x16xf32>
    %178 = arith.subf %174, %177 : vector<16x16xf32>
    %179 = math.exp %178 : vector<16x16xf32>
    %cst_57 = arith.constant dense<0.000000e+00> : vector<16xf32>
    %180 = vector.multi_reduction <add>, %179, %cst_57 [1] : vector<16x16xf32> to vector<16xf32>
    %181 = vector.shape_cast %180 : vector<16xf32> to vector<16x1xf32>
    %182 = tpu.reciprocal %181 {approx = true} : vector<16x1xf32> -> vector<16x1xf32>
    %183 = vector.extract_strided_slice %152 {offsets = [0, 8], sizes = [16, 8], strides = [1, 1]} : vector<16x32xf32> to vector<16x8xf32>
    %cst_58 = arith.constant dense<0.000000e+00> : vector<16x8xf32>
    %184 = tpu.matmul %179, %183, %cst_58 {dimension_numbers = #tpu.dot_dimension_numbers<[1], [0], [0], [1], [0, 0, 1, 1], [], []>} : vector<16x16xf32>, vector<16x8xf32>, vector<16x8xf32> -> vector<16x8xf32>
    %185 = vector.broadcast %182 : vector<16x1xf32> to vector<16x8xf32>
    %186 = arith.mulf %184, %185 : vector<16x8xf32>
    %187 = vector.extract_strided_slice %149 {offsets = [8, 0], sizes = [8, 32], strides = [1, 1]} : vector<32x32xf32> to vector<8x32xf32>
    %cst_59 = arith.constant dense<0.000000e+00> : vector<16x32xf32>
    %188 = tpu.matmul %186, %187, %cst_59 {dimension_numbers = #tpu.dot_dimension_numbers<[1], [0], [0], [1], [0, 0, 1, 1], [], []>} : vector<16x8xf32>, vector<8x32xf32>, vector<16x32xf32> -> vector<16x32xf32>
    %189 = arith.addf %170, %188 : vector<16x32xf32>
    %190 = vector.extract_strided_slice %150 {offsets = [0, 16], sizes = [16, 8], strides = [1, 1]} : vector<16x32xf32> to vector<16x8xf32>
    %191 = vector.extract_strided_slice %151 {offsets = [0, 16], sizes = [16, 8], strides = [1, 1]} : vector<16x32xf32> to vector<16x8xf32>
    %cst_60 = arith.constant dense<0.000000e+00> : vector<16x16xf32>
    %192 = tpu.matmul %190, %191, %cst_60 {dimension_numbers = #tpu.dot_dimension_numbers<[1], [1], [0], [0], [0, 0, 1, 0], [], []>} : vector<16x8xf32>, vector<16x8xf32>, vector<16x16xf32> -> vector<16x16xf32>
    %193 = arith.addf %192, %10 : vector<16x16xf32>
    %cst_61 = arith.constant dense<0xFF800000> : vector<16xf32>
    %194 = vector.multi_reduction <maximumf>, %193, %cst_61 [1] : vector<16x16xf32> to vector<16xf32>
    %195 = vector.shape_cast %194 : vector<16xf32> to vector<16x1xf32>
    %196 = vector.broadcast %195 : vector<16x1xf32> to vector<16x16xf32>
    %197 = arith.subf %193, %196 : vector<16x16xf32>
    %198 = math.exp %197 : vector<16x16xf32>
    %cst_62 = arith.constant dense<0.000000e+00> : vector<16xf32>
    %199 = vector.multi_reduction <add>, %198, %cst_62 [1] : vector<16x16xf32> to vector<16xf32>
    %200 = vector.shape_cast %199 : vector<16xf32> to vector<16x1xf32>
    %201 = tpu.reciprocal %200 {approx = true} : vector<16x1xf32> -> vector<16x1xf32>
    %202 = vector.extract_strided_slice %152 {offsets = [0, 16], sizes = [16, 8], strides = [1, 1]} : vector<16x32xf32> to vector<16x8xf32>
    %cst_63 = arith.constant dense<0.000000e+00> : vector<16x8xf32>
    %203 = tpu.matmul %198, %202, %cst_63 {dimension_numbers = #tpu.dot_dimension_numbers<[1], [0], [0], [1], [0, 0, 1, 1], [], []>} : vector<16x16xf32>, vector<16x8xf32>, vector<16x8xf32> -> vector<16x8xf32>
    %204 = vector.broadcast %201 : vector<16x1xf32> to vector<16x8xf32>
    %205 = arith.mulf %203, %204 : vector<16x8xf32>
    %206 = vector.extract_strided_slice %149 {offsets = [16, 0], sizes = [8, 32], strides = [1, 1]} : vector<32x32xf32> to vector<8x32xf32>
    %cst_64 = arith.constant dense<0.000000e+00> : vector<16x32xf32>
    %207 = tpu.matmul %205, %206, %cst_64 {dimension_numbers = #tpu.dot_dimension_numbers<[1], [0], [0], [1], [0, 0, 1, 1], [], []>} : vector<16x8xf32>, vector<8x32xf32>, vector<16x32xf32> -> vector<16x32xf32>
    %208 = arith.addf %189, %207 : vector<16x32xf32>
    %209 = vector.extract_strided_slice %150 {offsets = [0, 24], sizes = [16, 8], strides = [1, 1]} : vector<16x32xf32> to vector<16x8xf32>
    %210 = vector.extract_strided_slice %151 {offsets = [0, 24], sizes = [16, 8], strides = [1, 1]} : vector<16x32xf32> to vector<16x8xf32>
    %cst_65 = arith.constant dense<0.000000e+00> : vector<16x16xf32>
    %211 = tpu.matmul %209, %210, %cst_65 {dimension_numbers = #tpu.dot_dimension_numbers<[1], [1], [0], [0], [0, 0, 1, 0], [], []>} : vector<16x8xf32>, vector<16x8xf32>, vector<16x16xf32> -> vector<16x16xf32>
    %212 = arith.addf %211, %10 : vector<16x16xf32>
    %cst_66 = arith.constant dense<0xFF800000> : vector<16xf32>
    %213 = vector.multi_reduction <maximumf>, %212, %cst_66 [1] : vector<16x16xf32> to vector<16xf32>
    %214 = vector.shape_cast %213 : vector<16xf32> to vector<16x1xf32>
    %215 = vector.broadcast %214 : vector<16x1xf32> to vector<16x16xf32>
    %216 = arith.subf %212, %215 : vector<16x16xf32>
    %217 = math.exp %216 : vector<16x16xf32>
    %cst_67 = arith.constant dense<0.000000e+00> : vector<16xf32>
    %218 = vector.multi_reduction <add>, %217, %cst_67 [1] : vector<16x16xf32> to vector<16xf32>
    %219 = vector.shape_cast %218 : vector<16xf32> to vector<16x1xf32>
    %220 = tpu.reciprocal %219 {approx = true} : vector<16x1xf32> -> vector<16x1xf32>
    %221 = vector.extract_strided_slice %152 {offsets = [0, 24], sizes = [16, 8], strides = [1, 1]} : vector<16x32xf32> to vector<16x8xf32>
    %cst_68 = arith.constant dense<0.000000e+00> : vector<16x8xf32>
    %222 = tpu.matmul %217, %221, %cst_68 {dimension_numbers = #tpu.dot_dimension_numbers<[1], [0], [0], [1], [0, 0, 1, 1], [], []>} : vector<16x16xf32>, vector<16x8xf32>, vector<16x8xf32> -> vector<16x8xf32>
    %223 = vector.broadcast %220 : vector<16x1xf32> to vector<16x8xf32>
    %224 = arith.mulf %222, %223 : vector<16x8xf32>
    %225 = vector.extract_strided_slice %149 {offsets = [24, 0], sizes = [8, 32], strides = [1, 1]} : vector<32x32xf32> to vector<8x32xf32>
    %cst_69 = arith.constant dense<0.000000e+00> : vector<16x32xf32>
    %226 = tpu.matmul %224, %225, %cst_69 {dimension_numbers = #tpu.dot_dimension_numbers<[1], [0], [0], [1], [0, 0, 1, 1], [], []>} : vector<16x8xf32>, vector<8x32xf32>, vector<16x32xf32> -> vector<16x32xf32>
    %227 = arith.addf %208, %226 : vector<16x32xf32>
    %228 = arith.addf %119, %227 : vector<16x32xf32>
    %229 = vector.extract_strided_slice %6 {offsets = [4, 0], sizes = [1, 32], strides = [1, 1]} : vector<6x32xf32> to vector<1x32xf32>
    %230 = vector.extract_strided_slice %6 {offsets = [5, 0], sizes = [1, 32], strides = [1, 1]} : vector<6x32xf32> to vector<1x32xf32>
    %cst_70 = arith.constant dense<0.000000e+00> : vector<16xf32>
    %231 = vector.multi_reduction <add>, %228, %cst_70 [1] : vector<16x32xf32> to vector<16xf32>
    %232 = vector.shape_cast %231 : vector<16xf32> to vector<16x1xf32>
    %cst_71 = arith.constant 3.200000e+01 : f32
    %233 = vector.broadcast %cst_71 : f32 to vector<16x1xf32>
    %234 = arith.divf %232, %233 : vector<16x1xf32>
    %235 = vector.broadcast %234 : vector<16x1xf32> to vector<16x32xf32>
    %236 = arith.subf %228, %235 : vector<16x32xf32>
    %237 = arith.mulf %236, %236 : vector<16x32xf32>
    %cst_72 = arith.constant dense<0.000000e+00> : vector<16xf32>
    %238 = vector.multi_reduction <add>, %237, %cst_72 [1] : vector<16x32xf32> to vector<16xf32>
    %239 = vector.shape_cast %238 : vector<16xf32> to vector<16x1xf32>
    %cst_73 = arith.constant 3.200000e+01 : f32
    %240 = vector.broadcast %cst_73 : f32 to vector<16x1xf32>
    %241 = arith.divf %239, %240 : vector<16x1xf32>
    %cst_74 = arith.constant 9.99999974E-6 : f32
    %242 = vector.broadcast %cst_74 : f32 to vector<16x1xf32>
    %243 = arith.addf %241, %242 : vector<16x1xf32>
    %244 = math.rsqrt %243 : vector<16x1xf32>
    %245 = vector.broadcast %244 : vector<16x1xf32> to vector<16x32xf32>
    %246 = arith.mulf %236, %245 : vector<16x32xf32>
    %247 = vector.broadcast %229 : vector<1x32xf32> to vector<16x32xf32>
    %248 = arith.mulf %246, %247 : vector<16x32xf32>
    %249 = vector.broadcast %230 : vector<1x32xf32> to vector<16x32xf32>
    %250 = arith.addf %248, %249 : vector<16x32xf32>
    %c0_75 = arith.constant 0 : index
    %c0_76 = arith.constant 0 : index
    %c0_77 = arith.constant 0 : index
    %251 = vector.load %arg7[%c0_75, %c0_76, %c0_77] : memref<1x32x64xf32, #tpu.memory_space<vmem>>, vector<1x32x64xf32>
    %252 = vector.shape_cast %251 : vector<1x32x64xf32> to vector<32x64xf32>
    %cst_78 = arith.constant dense<0.000000e+00> : vector<16x64xf32>
    %253 = tpu.matmul %250, %252, %cst_78 {dimension_numbers = #tpu.dot_dimension_numbers<[1], [0], [0], [1], [0, 0, 1, 1], [], []>} : vector<16x32xf32>, vector<32x64xf32>, vector<16x64xf32> -> vector<16x64xf32>
    %cst_79 = arith.constant 5.000000e-01 : f32
    %254 = vector.broadcast %cst_79 : f32 to vector<16x64xf32>
    %255 = arith.mulf %254, %253 : vector<16x64xf32>
    %cst_80 = arith.constant 0.707106769 : f32
    %256 = vector.broadcast %cst_80 : f32 to vector<16x64xf32>
    %257 = arith.mulf %253, %256 : vector<16x64xf32>
    %258 = math.erf %257 : vector<16x64xf32>
    %cst_81 = arith.constant 1.000000e+00 : f32
    %259 = vector.broadcast %cst_81 : f32 to vector<16x64xf32>
    %260 = arith.addf %259, %258 : vector<16x64xf32>
    %261 = arith.mulf %255, %260 : vector<16x64xf32>
    %c0_82 = arith.constant 0 : index
    %c0_83 = arith.constant 0 : index
    %c0_84 = arith.constant 0 : index
    %262 = vector.load %arg8[%c0_82, %c0_83, %c0_84] : memref<1x64x32xf32, #tpu.memory_space<vmem>>, vector<1x64x32xf32>
    %263 = vector.shape_cast %262 : vector<1x64x32xf32> to vector<64x32xf32>
    %cst_85 = arith.constant dense<0.000000e+00> : vector<16x32xf32>
    %264 = tpu.matmul %261, %263, %cst_85 {dimension_numbers = #tpu.dot_dimension_numbers<[1], [0], [0], [1], [0, 0, 1, 1], [], []>} : vector<16x64xf32>, vector<64x32xf32>, vector<16x32xf32> -> vector<16x32xf32>
    %265 = arith.addf %228, %264 : vector<16x32xf32>
    %c0_86 = arith.constant 0 : index
    %c0_87 = arith.constant 0 : index
    %266 = vector.load %arg10[%c0_86, %c0_87] : memref<16x32xf32, #tpu.memory_space<vmem>>, vector<16x32xf32>
    tpu.vector_store %arg10[%c0_86, %c0_87], %265 {strides = array<i32>} : memref<16x32xf32, #tpu.memory_space<vmem>>, vector<16x32xf32>,
    %c1_i32 = arith.constant 1 : i32
    %267 = arith.cmpi eq, %arg0, %c1_i32 : i32
    %268 = arith.extui %267 : i1 to i32
    %c0_i32_88 = arith.constant 0 : i32
    %269 = arith.cmpi ne, %268, %c0_i32_88 : i32
    scf.if %269 {
      %c0_89 = arith.constant 0 : index
      %c0_90 = arith.constant 0 : index
      %270 = vector.load %arg9[%c0_89, %c0_90] : memref<16x32xf32, #tpu.memory_space<vmem>>, vector<16x32xf32>
      tpu.vector_store %arg9[%c0_89, %c0_90], %265 {strides = array<i32>} : memref<16x32xf32, #tpu.memory_space<vmem>>, vector<16x32xf32>,
    } else {
    }
    return
  }
  func.func @transform_0(%arg0: i32) -> (i32, i32) {
    %c0_i32 = arith.constant 0 : i32
    %c0_i32_0 = arith.constant 0 : i32
    %c0_i32_1 = arith.constant 0 : i32
    return %c0_i32, %c0_i32_0 : i32, i32
  }
  func.func @transform_1(%arg0: i32) -> (i32, i32) {
    %c0_i32 = arith.constant 0 : i32
    %c0_i32_0 = arith.constant 0 : i32
    %c0_i32_1 = arith.constant 0 : i32
    return %c0_i32, %c0_i32_0 : i32, i32
  }
  func.func @transform_2(%arg0: i32) -> (i32, i32) {
    %c0_i32 = arith.constant 0 : i32
    %c0_i32_0 = arith.constant 0 : i32
    %c0_i32_1 = arith.constant 0 : i32
    return %c0_i32, %c0_i32_0 : i32, i32
  }
  func.func @transform_3(%arg0: i32) -> (i32, i32) {
    %c0_i32 = arith.constant 0 : i32
    %c0_i32_0 = arith.constant 0 : i32
    %c0_i32_1 = arith.constant 0 : i32
    return %c0_i32, %c0_i32_0 : i32, i32
  }
  func.func @transform_4(%arg0: i32) -> (i32, i32, i32) {
    %c0_i32 = arith.constant 0 : i32
    %c0_i32_0 = arith.constant 0 : i32
    %c0_i32_1 = arith.constant 0 : i32
    return %arg0, %c0_i32, %c0_i32_0 : i32, i32, i32
  }
  func.func @transform_5(%arg0: i32) -> (i32, i32, i32, i32) {
    %c0_i32 = arith.constant 0 : i32
    %c0_i32_0 = arith.constant 0 : i32
    %c0_i32_1 = arith.constant 0 : i32
    %c0_i32_2 = arith.constant 0 : i32
    return %arg0, %c0_i32, %c0_i32_0, %c0_i32_1 : i32, i32, i32, i32
  }
  func.func @transform_6(%arg0: i32) -> (i32, i32, i32) {
    %c0_i32 = arith.constant 0 : i32
    %c0_i32_0 = arith.constant 0 : i32
    %c0_i32_1 = arith.constant 0 : i32
    return %arg0, %c0_i32, %c0_i32_0 : i32, i32, i32
  }
  func.func @transform_7(%arg0: i32) -> (i32, i32, i32) {
    %c0_i32 = arith.constant 0 : i32
    %c0_i32_0 = arith.constant 0 : i32
    %c0_i32_1 = arith.constant 0 : i32
    return %arg0, %c0_i32, %c0_i32_0 : i32, i32, i32
  }
  func.func @transform_8(%arg0: i32) -> (i32, i32) {
    %c0_i32 = arith.constant 0 : i32
    %c0_i32_0 = arith.constant 0 : i32
    %c0_i32_1 = arith.constant 0 : i32
    return %c0_i32, %c0_i32_0 : i32, i32
  }
}

</mosaic_0001>

<bundles_post_ra>
// kernel: le.8
= control target key start
LH: loop header
LB: loop body
LE: loop exit
PB: predicated region body
PF: predicated region fallthrough
CT: control target
= control target key end

     0   :  { %vm7_vm0 = vcmask 64512   ;;  %vm13_vm1 = vcmask 130112   ;;  %s39_s0 = inlined_call_operand.vmem [shape: s32[2,8], index: 0, kind: input, shape index: {}]   ;;  %s40_s1 = inlined_call_operand.vmem [shape: s32[16], index: 1, kind: output, shape index: {}]  }
   0x1   :  { %v4_v0 = vld [vmem:[%s39_s0] sm:$0x3]  ;;  %s22_s0 = smov 8  }
   0x2   :  { %5 = vst [vmem:[#allocation1] sm:$0x3] %v4_v0 }
   0x9   :  { %v10_v1 = vld [vmem:[#allocation1 + $0x1] sm:$0x1]   ;;  %v6_v2 = vld [vmem:[#allocation1] sm:$0x1]  }
   0xa   :  { %11 = vrot.lane.b32.xlu0 %v10_v1, %s22_s0  ;;  %8 = vst.msk [vmem:[#allocation0] sm:$0x1] %vm7_vm0, %v6_v2  }
  0x7c   :  { %v12_v3 = vpop.permute.xlu0 %11  }
  0x7d   :  { %14 = vst.msk [vmem:[#allocation0] sm:$0x1] %vm13_vm1, %v12_v3  }
  0x84   :  { %v18_v4 = vld [vmem:[#allocation0] sm:$0x1] }
  0x85   :  { %20 = vst [vmem:[%s40_s1] sm:$0x1] %v18_v4 }

// kernel: transformer_forward.1
= control target key start
LH: loop header
LB: loop body
LE: loop exit
PB: predicated region body
PF: predicated region fallthrough
CT: control target
= control target key end

     0   :  { %13 = vsyncpa [#allocation4], 0  ;;  %s5027_s0 = inlined_call_operand.vmem [shape: f32[16,32], index: 0, kind: input, shape index: {}]   ;;  %s5028_s1 = inlined_call_operand.vmem [shape: f32[16,32], index: 1, kind: input, shape index: {}]   ;;  %s5029_s2 = inlined_call_operand.vmem [shape: f32[16,16], index: 2, kind: input, shape index: {}]   ;;  %s5030_s3 = inlined_call_operand.vmem [shape: f32[16,16], index: 3, kind: input, shape index: {}]   ;;  %s5031_s4 = inlined_call_operand.vmem [shape: f32[2,6,32], index: 4, kind: input, shape index: {}]   ;;  %s5032_s5 = inlined_call_operand.hbm [shape: f32[2,8,32,32], index: 5, kind: input, shape index: {}]   ;;  %s5033_s6 = inlined_call_operand.vmem [shape: f32[2,32,64], index: 6, kind: input, shape index: {}]   ;;  %s5034_s7 = inlined_call_operand.vmem [shape: f32[2,64,32], index: 7, kind: input, shape index: {}]   ;;  %s5035_s8 = inlined_call_operand.hbm [shape: f32[16,32], index: 8, kind: output, shape index: {}]  }
   0x1   :  { %15 = vsyncpa [#allocation4 + $0x1], 0 }
   0x2   :  { %16 = vsyncpa [#allocation5], 0  ;;  %s4537_s27 = smov 0   ;;  %s4539_s28 = smov 0  }
   0x3   :  { %s4541_s29 = smov 0   ;;  %s4543_s30 = smov 0  }
   0x4 LB: > { %s4556_s9 = sadd.s32 4294967295, %s4481_s30   ;;  %s4559_s10 = sadd.s32 1, %s4481_s30   ;;  %s4481_s30 = sphi %s4543_s30, %s5044_s30   ;;  %s4477_s29 = sphi %s4541_s29, %s5043_s29   ;;  %s4473_s28 = sphi %s4539_s28, %s5042_s28   ;;  %s4469_s27 = sphi %s4537_s27, %s5041_s27  }
   0x5   : > { %s136_s11 = ssub.s32 %s4481_s30, %s4559_s10  ;;  %s139_s12 = sadd.s32 1, %s4477_s29 }
   0x6   : > { %p137_p0 = scmp.eq.s32.totalorder %s136_s11, 0  ;;  %p146_p1 = scmp.ne.s32.totalorder %s4477_s29, %s4473_s28 }
   0x7   : > { %p147_p2 = scmp.eq.s32.totalorder %s4481_s30, 0  ;;  %p152_p3 = scmp.ne.s32.totalorder %s4473_s28, %s4469_s27 }
   0x8   : > { %s4569_s13 = scalar_select %p137_p0, %s4477_s29, %s139_s12  }
   0x9   : > { %p148_p4 = por %p147_p2, %p146_p1  ;;  %p153_p5 = scmp.eq.s32.totalorder %s4556_s9, 0 }
   0xa   : > { %p4203_p6 = scmp.lt.s32.totalorder %s4481_s30, 2  ;;  %s268_s15 = sand.u32 1, %s4477_s29  }
   0xb   : > { %p4573_p7 = por %p153_p5, %p152_p3  ;;  %s3542_s16 = sshll.u32 %s268_s15, 8 }
   0xc   : > { %s3638_s17 = sshll.u32 %s4481_s30, 12  ;;  %s272_s21 = scalar_lea.vmem [#allocation3], %s3542_s16 }
   0xd   : > { %s4582_s20 = scalar_lea.hbm %s5032_s5, %s3638_s17  ;;  %s279_s22 = sshll.u32 %s272_s21, 4  ;;  %s4584_s22 = int_to_ptr.vmem [resolvable:$true] %s279_s22 }
   0xe   : > { %p4586_p8 = pnand %p4203_p6, %p148_p4  ;;  %s4591_s24 = scalar_lea.sflag [#allocation4], %s268_s15 }
   0xf   : > { %s4387_s25 = scalar_lea.hbm %s4582_s20, 4096  ;;  %s4392_s11 = scalar_lea.hbm %s5032_s5, 8192 }
  0x10   : > { %p4388_p10 = scmp.ne.s32.totalorder %s4582_s20, %s4387_s25  ;;  %p4389_p11 = pneg %p4586_p8 }
  0x11   : > { %p4393_p0 = scmp.lt.u32.totalorder %s4582_s20, %s5032_s5  ;;  %p4394_p1 = scmp.lt.u32.totalorder %s4392_s11, %s4387_s25 }
  0x12   : > { %p4390_p12 = pnand %p4389_p11, %p4388_p10  ;;  %p4396_p3 = scmp.lt.u32.totalorder %s4387_s25, %s4582_s20 }
  0x13   : > { %p4395_p2 = por %p4394_p1, %p4393_p0 }
  0x14   : > { %p4391_p13 = pneg %p4390_p12 }
  0x15   : > { %p4397_p4 = por %p4396_p3, %p4395_p2 }
  0x17   : > { %p4398_p5 = pnand %p4397_p4, %p4391_p13 }
  0x19   : > { %4401 = shalt.err (!%p4398_p5)
}
  0x1a   : > { %s4402_s15 = scalar_lea.vmem %s4584_s22, 4096  ;;  %s4483_s17 = smov [#allocation3]  }
  0x1b   : > { %p4403_p6 = scmp.ne.s32.totalorder %s4584_s22, %s4402_s15  ;;  %s4407_s18 = sshll.u32 %s4483_s17, 4  ;;  %s4408_s18 = int_to_ptr.vmem [resolvable:$false] %s4407_s18 }
  0x1c   : > { %s4409_s19 = scalar_lea.vmem %s4408_s18, 8192  ;;  %p4410_p9 = scmp.lt.s32.totalorder %s4584_s22, %s4408_s18 }
  0x1d   : > { %p4405_p10 = pnand %p4403_p6, %p4389_p11  ;;  %p4411_p0 = scmp.lt.s32.totalorder %s4409_s19, %s4402_s15 }
  0x1f   : > { %p4406_p12 = pneg %p4405_p10  ;;  %p4412_p1 = por %p4411_p0, %p4410_p9 }
  0x21   : > { %p4413_p2 = pnand %p4412_p1, %p4406_p12 }
  0x23   : > { %4416 = shalt.err (!%p4413_p2)
}
  0x24   : > { %s4484_s21 = smov 128   ;;  %s4485_s25 = smov 8  }
  0x25   : > { %4202 = dma.hbm_to_vmem [thread:$0]  (!%p4586_p8), %s4582_s20, 4096, %s4584_s22, %s4591_s24, %s4484_s21, %s4484_s21, %s4485_s25  }
  0x26   : > { %p303_p11 = scmp.lt.s32.totalorder %s4481_s30, 3  ;;  %p5038_p13 = scmp.ge.s32.totalorder %s4481_s30, 1 }
  0x28   : > { %p304_p3 = pnand %p5038_p13, %p303_p11 }
  0x29   : > { %s309_s26 = sand.u32 (!%p304_p3), 1, %s4473_s28  }
  0x2a   : > { %307 = sbr.rel (%p304_p3) target bundleno = 4942 (0x134e), region = 52  ;;  %s3546_s27 = sshll.u32 (!%p304_p3), %s309_s26, 8 }
  0x2b   : > { %s310_s11 = scalar_lea.sflag (!%p304_p3), [#allocation4], %s309_s26  ;;  %s4623_s12 = scalar_lea.vmem (!%p304_p3), [#allocation3], %s3546_s27 }
  0x31   : > { %4460 = dma.done.wait (%p4573_p7), %s310_s11, 4096  }
  0x32   : > { %4462 = vsyncadd (%p4573_p7), %s310_s11, 4294963200  ;;  %p355_p9 = scmp.lt.s32.totalorder %s4556_s9, 1  ;;  %p3552_p7 = scmp.ne.s32.totalorder %s4556_s9, 0 }
  0x33   : > { %v373_v0 = vld [vmem:[%s5027_s0] sm:$0xff] (!%p3552_p7)  ;;  %vm375_vm0 = vcmask (!%p3552_p7), 261120   ;;  %v374_v1 = vld [vmem:[%s5027_s0 + $0x8] sm:$0xff] (!%p3552_p7) }
  0x34   : > { %s356_s20 = scalar_select %p355_p9, %s4556_s9, 1 }
  0x35   : > { %372 = sbr.rel (%p3552_p7) target bundleno = 60 (0x3c), region = 60  ;;  %376 = vst.msk [vmem:[#allocation2] sm:$0xff] (!%p3552_p7), %vm375_vm0, %v373_v0  ;;  %377 = vst.msk [vmem:[#allocation2 + $0x8] sm:$0xff] (!%p3552_p7), %vm375_vm0, %v374_v1 }
  0x36   : > { %s3547_s22 = sshll.u32 %s356_s20, 3  ;;  %s3639_s30 = sshll.u32 %s356_s20, 5 }
  0x37   : > { %s4634_s16 = scalar_lea.vmem %s5031_s4, %s3547_s22  ;;  %s4639_s18 = scalar_lea.vmem %s5033_s6, %s3639_s30 }
  0x38   : > { %s3640_s19 = sshll.u32 %s356_s20, 6 }
  0x39   : > { %s4644_s25 = scalar_lea.vmem %s5034_s7, %s3640_s19 }
  0x3c PF: > { %v4653_v2 = vld [vmem:[#allocation2] sm:$0xff]  ;;  %vm419_vm1 = vcmask 261120   ;;  %v4655_v3 = vld [vmem:[#allocation2 + $0x8] sm:$0xff]  ;;  %v383_v16 = vld [vmem:[%s4623_s12] sm:$0xff]  ;;  %v447_v33 = vlaneseq  ;;  %vm690_vm2 = vcmask 64512   ;;  %s4486_s20 = smov 120  }
  0x3d   : > { %v420_v4 = vsel %vm419_vm1, %v4653_v2, 0.0  ;;  %v423_v5 = vsel %vm419_vm1, %v4655_v3, 0.0  ;;  %v384_v17 = vld [vmem:[%s4623_s12 + $0x8] sm:$0xff]  ;;  %v391_v18 = vld [vmem:[%s4623_s12 + $0x40] sm:$0xff]  ;;  %v385_v21 = vld [vmem:[%s4623_s12 + $0x10] sm:$0xff]  ;;  %s4487_s30 = smov 112  }
  0x3e   : > { %421 = vadd.xlane.f32.xlu0 %v420_v4  ;;  %v4029_v19 = vpack.c.bf16 %v384_v17, %v383_v16  ;;  %v392_v20 = vld [vmem:[%s4623_s12 + $0x48] sm:$0xff]  ;;  %v386_v22 = vld [vmem:[%s4623_s12 + $0x18] sm:$0xff]  ;;  %v393_v25 = vld [vmem:[%s4623_s12 + $0x50] sm:$0xff]  ;;  %v4675_v37 = vshrl.u32 %v447_v33, 7  ;;  %vm778_vm4 = vcmask 130048   ;;  %s4488_s19 = smov 104  }
  0x3f   : > { %v4045_v23 = vpack.c.bf16 %v392_v20, %v391_v18  ;;  %v4033_v24 = vpack.c.bf16 %v386_v22, %v385_v21  ;;  %v394_v26 = vld [vmem:[%s4623_s12 + $0x58] sm:$0xff]  ;;  %v387_v28 = vld [vmem:[%s4623_s12 + $0x20] sm:$0xff]  ;;  %v388_v29 = vld [vmem:[%s4623_s12 + $0x28] sm:$0xff]  ;;  %vm3352_vm5 = vcmask 523264   ;;  %p3633_p8 = scmp.ne.s32.totalorder %s4556_s9, 1 }
  0x40   : > { %4030 = vmatprep.subr.bf16.mxu1 %v4029_v19  ;;  %v4049_v27 = vpack.c.bf16 %v394_v26, %v393_v25  ;;  %v4037_v30 = vpack.c.bf16 %v388_v29, %v387_v28  ;;  %v449_v39 = vsub.s32 0, %v4675_v37  ;;  %v4679_v40 = vld [vmem:[%s4634_s16] sm:$0x3f]  ;;  %v455_v41 = vsub.s32 1, %v4675_v37  ;;  %v390_v51 = vld [vmem:[%s4623_s12 + $0x38] sm:$0xff]  ;;  %vm4699_vm3 = vmpackc.low %vm690_vm2, %vm690_vm2 }
  0x41   : > { %4032 = vmatpush3.bf16.msra.mxu1 %v4029_v19  ;;  %4046 = vmatprep.subr.bf16.mxu0 %v4045_v23  ;;  %v389_v50 = vld [vmem:[%s4623_s12 + $0x30] sm:$0xff]  ;;  %v4727_v16 = vld [vmem:[%s5029_s2 + $0x8] sm:$0xff] }
  0x42   : > { %424 = vadd.xlane.f32.xlu0 %v423_v5  ;;  %4048 = vmatpush3.bf16.msra.mxu0 %v4045_v23  ;;  %v450_v42 = vrot.slane %v4679_v40, %v449_v39  ;;  %v456_v45 = vrot.slane %v4679_v40, %v455_v41  ;;  %v4041_v54 = vpack.c.bf16 %v390_v51, %v389_v50  ;;  %v4732_v17 = vld [vmem:[%s5029_s2] sm:$0xff] }
  0x43   : > { %4034 = vmatprep.subr.bf16.mxu1 %v4033_v24  ;;  %4050 = vmatprep.subr.bf16.mxu0 %v4049_v27 }
  0x45   : > { %4036 = vmatpush3.bf16.msra.mxu1 %v4033_v24 }
  0x46   : > { %4052 = vmatpush3.bf16.msra.mxu0 %v4049_v27  ;;  %4038 = vmatprep.subr.bf16.mxu1 %v4037_v30 }
  0xcb   : > { %v422_v6 = vpop.xlane.xlu0 %421 }
  0xcc   : > { %v427_v7 = vmul.f32 0.03125, %v422_v6 }
  0xce   : > { %v429_v8 = vsub.f32 %v4653_v2, %v427_v7 }
  0xcf   : > { %v425_v9 = vpop.xlane.xlu0 %424 }
  0xd0   : > { %v428_v10 = vmul.f32 0.03125, %v425_v9  ;;  %v431_v11 = vmul.f32 %v429_v8, %v429_v8 }
  0xd2   : > { %v430_v12 = vsub.f32 %v4655_v3, %v428_v10  ;;  %v433_v13 = vsel %vm419_vm1, %v431_v11, 0.0 }
  0xd3   : > { %434 = vadd.xlane.f32.xlu1 %v433_v13 }
  0xd4   : > { %v432_v14 = vmul.f32 %v430_v12, %v430_v12 }
  0xd6   : > { %v436_v15 = vsel %vm419_vm1, %v432_v14, 0.0 }
  0xd7   : > { %437 = vadd.xlane.f32.xlu1 %v436_v15 }
 0x160   : > { %v435_v31 = vpop.xlane.xlu1 %434 }
 0x161   : > { %v439_v32 = vmul.f32 0.03125, %v435_v31 }
 0x163   : > { %v441_v34 = vadd.f32 1e-05, %v439_v32 }
 0x164   : > { %v438_v35 = vpop.xlane.xlu1 %437 }
 0x165   : > { %4306 = vrsqrt.f32 %v441_v34  ;;  %v440_v36 = vmul.f32 0.03125, %v438_v35 }
 0x167   : > { %v442_v38 = vadd.f32 1e-05, %v440_v36 }
 0x169   : > { %4308 = vrsqrt.f32 %v442_v38 }
 0x16f   : > { %v4307_v43 = vpop.eup %4306 }
 0x170   : > { %v445_v44 = vmul.f32 %v4307_v43, %v429_v8 }
 0x172   : > { %v451_v46 = vmul.f32 %v450_v42, %v445_v44 }
 0x173   : > { %v4309_v47 = vpop.eup %4308 }
 0x174   : > { %v457_v48 = vadd.f32 %v456_v45, %v451_v46  ;;  %v446_v49 = vmul.f32 %v4309_v47, %v430_v12 }
 0x176   : > { %3789 = vmatprep.mubr.msk.f32.mxu1 %vm419_vm1, %v457_v48  ;;  %3811 = vmatprep.mubr.msk.f32.mxu0 %vm419_vm1, %v457_v48  ;;  %v452_v52 = vmul.f32 %v450_v42, %v446_v49 }
 0x178   : > { %v458_v53 = vadd.f32 %v456_v45, %v452_v52 }
 0x17a   : > { %3790 = vmatmul.mubr.msk.f32.vlgmr.msra.gmra.mrb[0].mxu1 %vm419_vm1, %v458_v53  ;;  %3812 = vmatmul.mubr.msk.f32.vlgmr.msra.gmra.mrb[0].mxu0 %vm419_vm1, %v458_v53 }
 0x17b   : > { %4040 = vmatpush3.bf16.msra.mxu1 %v4037_v30  ;;  %3800 = vmatprep.mubr.msk.f32.mxu1 %vm419_vm1, %v457_v48 }
 0x17c   : > { %4042 = vmatprep.subr.bf16.mxu1 %v4041_v54 }
 0x17f   : > { %4044 = vmatpush3.bf16.msra.mxu1 %v4041_v54 }
 0x182   : > { %3801 = vmatmul.mubr.msk.f32.vlgmr.msra.gmra.mrb[2].mxu1 %vm419_vm1, %v458_v53 }
 0x24d   : > { %v3791_v55 = vpop.f32.mrb[0].mxu1  ;;  %v3813_v56 = vpop.f32.mrb[0].mxu0 }
 0x24e   : > { %v531_v57 = vpop.f32.mrb[1].mxu1  ;;  %v681_v58 = vpop.f32.mrb[1].mxu0 }
 0x24f   : > { %882 = vrot.lane.b32.xlu1 %v531_v57, %s4486_s20  ;;  %3818 = vmatprep.mubr.msk.f32.mxu1 %vm690_vm2, %v531_v57  ;;  %v4059_v59 = vpack.c.bf16 %v3813_v56, %v681_v58  ;;  %v4694_v60 = vpack.i.bf16 %v3813_v56, %v681_v58 }
 0x251   : > { %4060 = vmatprep.subr.bf16.mxu0 %v4059_v59 }
 0x252   : > { %4062 = vmatpush3.bf16.msra.mxu0 %v4059_v59 }
 0x253   : > { %884 = vrot.lane.b32.xlu1 %v3791_v55, %s4486_s20 }
 0x255   : > { %v3802_v61 = vpop.f32.mrb[2].mxu1 }
 0x256   : > { %v606_v62 = vpop.f32.mrb[3].mxu1 }
 0x257   : > { %v4053_v63 = vpack.c.bf16 %v3802_v61, %v606_v62  ;;  %v4251_v0 = vpack.i.bf16 %v3802_v61, %v606_v62 }
 0x259   : > { %4252 = vrot.lane.b32.xlu1 %v4251_v0, %s4487_s30  ;;  %4247 = vrot.lane.b32.xlu0 %v4251_v0, %s4486_s20 }
 0x25a   : > { %4055 = vmatprep.subr.msk.bf16.mxu1 %vm4699_vm3, %v4053_v63 }
 0x25b   : > { %4058 = vmatpush3.bf16.xpose.msk.msra.mxu1 %vm4699_vm3, %v4053_v63 }
 0x25d   : > { %1248 = vrot.lane.b32.xlu1 %v3791_v55, %s4487_s30  ;;  %1246 = vrot.lane.b32.xlu0 %v531_v57, %s4487_s30 }
 0x262   : > { %3819 = vmatmul.mubr.msk.f32.vlgmr.msra.gmra.mrb[4].mxu1 %vm690_vm2, %v3791_v55 }
 0x2c1   : > { %v883_v4 = vpop.permute.xlu1 %882 }
 0x2c2   : > { %3832 = vmatprep.mubr.msk.f32.mxu1 %vm690_vm2, %v883_v4 }
 0x2c5   : > { %v885_v5 = vpop.permute.xlu1 %884 }
 0x2cb   : > { %v4253_v6 = vpop.permute.xlu1 %4252  ;;  %v4248_v7 = vpop.permute.xlu0 %4247 }
 0x2cc   : > { %v4255_v8 = vunpack.i.h.bf16 %v4253_v6  ;;  %v4254_v9 = vunpack.i.l.bf16 %v4253_v6  ;;  %v4250_v10 = vunpack.i.h.bf16 %v4248_v7  ;;  %v4249_v11 = vunpack.i.l.bf16 %v4248_v7 }
 0x2ce   : > { %v4063_v12 = vpack.c.bf16 %v4250_v10, %v4249_v11  ;;  %v4073_v13 = vpack.c.bf16 %v4255_v8, %v4254_v9  ;;  %v396_v9 = vld [vmem:[%s4623_s12 + $0x68] sm:$0xff]  ;;  %v395_v10 = vld [vmem:[%s4623_s12 + $0x60] sm:$0xff] }
 0x2cf   : > { %v1247_v14 = vpop.permute.xlu0 %1246  ;;  %v1249_v15 = vpop.permute.xlu1 %1248 }
 0x2d0   : > { %4065 = vmatprep.subr.msk.bf16.mxu1 %vm4699_vm3, %v4063_v12 }
 0x2d1   : > { %4068 = vmatpush3.bf16.xpose.msk.msra.mxu1 %vm4699_vm3, %v4063_v12 }
 0x2d2   : > { %4075 = vmatprep.subr.msk.bf16.mxu1 %vm4699_vm3, %v4073_v13 }
 0x2d8   : > { %3833 = vmatmul.mubr.msk.f32.vlgmr.msra.gmra.mrb[6].mxu1 %vm690_vm2, %v885_v5 }
 0x2d9   : > { %4078 = vmatpush3.bf16.xpose.msk.msra.mxu1 %vm4699_vm3, %v4073_v13  ;;  %3856 = vmatprep.mubr.msk.f32.mxu1 %vm690_vm2, %v1247_v14 }
 0x2e0   : > { %3857 = vmatmul.mubr.msk.f32.vlgmr.msra.gmra.mrb[8].mxu1 %vm690_vm2, %v1249_v15 }
 0x335   : > { %v3820_v18 = vpop.f32.mrb[4].mxu1 }
 0x336   : > { %v775_v19 = vadd.f32 %v3820_v18, %v4727_v16  ;;  %v769_v20 = vpop.f32.mrb[5].mxu1 }
 0x337   : > { %v770_v21 = vadd.f32 %v769_v20, %v4732_v17 }
 0x338   : > { %v782_v22 = vsel %vm778_vm4, %v775_v19, -inf }
 0x339   : > { %783 = vmax.xlane.f32.xlu1 %v782_v22  ;;  %v779_v23 = vsel %vm778_vm4, %v770_v21, -inf }
 0x33a   : > { %780 = vmax.xlane.f32.xlu0 %v779_v23 }
 0x34a   : > { %4262 = vrot.lane.b32.xlu1 %v4251_v0, %s4488_s19 }
 0x34e   : > { %1529 = vrot.lane.b32.xlu1 %v531_v57, %s4488_s19 }
 0x352   : > { %1531 = vrot.lane.b32.xlu1 %v3791_v55, %s4488_s19 }
 0x3ab   : > { %v3834_v24 = vpop.f32.mrb[6].mxu1 }
 0x3ac   : > { %v970_v25 = vadd.f32 %v3834_v24, %v4727_v16  ;;  %v964_v26 = vpop.f32.mrb[7].mxu1 }
 0x3ad   : > { %v965_v27 = vadd.f32 %v964_v26, %v4732_v17 }
 0x3ae   : > { %v976_v28 = vsel %vm778_vm4, %v970_v25, -inf }
 0x3af   : > { %977 = vmax.xlane.f32.xlu0 %v976_v28  ;;  %v973_v29 = vsel %vm778_vm4, %v965_v27, -inf }
 0x3b3   : > { %v3858_v30 = vpop.f32.mrb[8].mxu1  ;;  %974 = vmax.xlane.f32.xlu0 %v973_v29 }
 0x3b4   : > { %v1328_v31 = vpop.f32.mrb[9].mxu1  ;;  %v1334_v62 = vadd.f32 %v3858_v30, %v4727_v16 }
 0x3b5   : > { %v1329_v4 = vadd.f32 %v1328_v31, %v4732_v17 }
 0x3b6   : > { %v1340_v5 = vsel %vm778_vm4, %v1334_v62, -inf }
 0x3b7   : > { %v1337_v7 = vsel %vm778_vm4, %v1329_v4, -inf }
 0x3c6   : > { %v784_v32 = vpop.xlane.xlu1 %783 }
 0x3c7   : > { %v786_v33 = vsub.f32 %v775_v19, %v784_v32  ;;  %v781_v34 = vpop.xlane.xlu0 %780 }
 0x3c8   : > { %v785_v35 = vsub.f32 %v770_v21, %v781_v34 }
 0x3c9   : > { %v789_v36 = vmul.f32 1.442695, %v786_v33  ;;  %4257 = vrot.lane.b32.xlu0 %v4694_v60, %s4486_s20 }
 0x3ca   : > { %v787_v38 = vmul.f32 1.442695, %v785_v35  ;;  %v4263_v39 = vpop.permute.xlu1 %4262 }
 0x3cb   : > { %v4265_v41 = vunpack.i.h.bf16 %v4263_v39  ;;  %v4264_v42 = vunpack.i.l.bf16 %v4263_v39 }
 0x3cc   : > { %4310 = vpow2.f32 %v787_v38 }
 0x3cd   : > { %4312 = vpow2.f32 %v789_v36  ;;  %v4083_v43 = vpack.c.bf16 %v4265_v41, %v4264_v42 }
 0x3ce   : > { %v1530_v44 = vpop.permute.xlu1 %1529 }
 0x3cf   : > { %4085 = vmatprep.subr.msk.bf16.mxu1 %vm4699_vm3, %v4083_v43  ;;  %3875 = vmatprep.mubr.msk.f32.mxu1 %vm690_vm2, %v1530_v44 }
 0x3d0   : > { %4088 = vmatpush3.bf16.xpose.msk.msra.mxu1 %vm4699_vm3, %v4083_v43 }
 0x3d2   : > { %v1532_v46 = vpop.permute.xlu1 %1531 }
 0x3d6   : > { %v4311_v45 = vpop.eup %4310 }
 0x3d7   : > { %v4313_v47 = vpop.eup %4312  ;;  %3825 = vmatprep.mubr.msk.f32.mxu0 %vm778_vm4, %v4311_v45  ;;  %3876 = vmatmul.mubr.msk.f32.vlgmr.msra.gmra.mrb[10].mxu1 %vm690_vm2, %v1532_v46  ;;  %v791_v48 = vsel %vm778_vm4, %v4311_v45, 0.0 }
 0x3d8   : > { %3826 = vmatmul.mubr.msk.f32.vlgmr.msra.gmra.mrb[2].mxu0 %vm778_vm4, %v4313_v47  ;;  %v794_v49 = vsel %vm778_vm4, %v4313_v47, 0.0  ;;  %v397_v47 = vld [vmem:[%s4623_s12 + $0x70] sm:$0xff] }
 0x3e8   : > { %792 = vadd.xlane.f32.xlu0 %v791_v48 }
 0x3ec   : > { %795 = vadd.xlane.f32.xlu0 %v794_v49 }
 0x43c   : > { %v978_v50 = vpop.xlane.xlu0 %977 }
 0x43d   : > { %v980_v51 = vsub.f32 %v970_v25, %v978_v50 }
 0x43f   : > { %v983_v52 = vmul.f32 1.442695, %v980_v51 }
 0x440   : > { %v975_v53 = vpop.xlane.xlu0 %974 }
 0x441   : > { %4314 = vpow2.f32 %v983_v52  ;;  %v979_v54 = vsub.f32 %v965_v27, %v975_v53 }
 0x443   : > { %v981_v55 = vmul.f32 1.442695, %v979_v54 }
 0x444   : > { %v4258_v56 = vpop.permute.xlu0 %4257 }
 0x445   : > { %4316 = vpow2.f32 %v981_v55  ;;  %v4260_v57 = vunpack.i.h.bf16 %v4258_v56  ;;  %v4259_v58 = vunpack.i.l.bf16 %v4258_v56 }
 0x447   : > { %v4069_v59 = vpack.c.bf16 %v4260_v57, %v4259_v58 }
 0x449   : > { %4070 = vmatprep.subr.bf16.mxu0 %v4069_v59 }
 0x44a   : > { %4072 = vmatpush3.bf16.msra.mxu0 %v4069_v59 }
 0x44b   : > { %v4315_v61 = vpop.eup %4314  ;;  %3842 = vmatprep.subr.mxu0 %v396_v9 }
 0x44c   : > { %v988_v63 = vsel %vm778_vm4, %v4315_v61, 0.0 }
 0x44d   : > { %989 = vadd.xlane.f32.xlu1 %v988_v63 }
 0x44f   : > { %v4317_v0 = vpop.eup %4316 }
 0x450   : > { %3839 = vmatprep.mubr.msk.f32.mxu0 %vm778_vm4, %v4317_v0  ;;  %v985_v6 = vsel %vm778_vm4, %v4317_v0, 0.0 }
 0x451   : > { %1341 = vmax.xlane.f32.xlu1 %v1340_v5  ;;  %986 = vadd.xlane.f32.xlu0 %v985_v6 }
 0x452   : > { %3840 = vmatmul.mubr.msk.f32.vlgmr.msra.gmra.mrb[4].mxu0 %vm778_vm4, %v4315_v61 }
 0x453   : > { %3843 = vmatpush3.msra.mxu0 %v396_v9 }
 0x454   : > { %3847 = vmatprep.subr.mxu0 %v395_v10 }
 0x455   : > { %1338 = vmax.xlane.f32.xlu0 %v1337_v7 }
 0x46b   : > { %4267 = vrot.lane.b32.xlu0 %v4694_v60, %s4487_s30 }
 0x475   : > { %v793_v8 = vpop.xlane.xlu0 %792 }
 0x476   : > { %4318 = vrcp.f32 %v793_v8 }
 0x479   : > { %v796_v23 = vpop.xlane.xlu0 %795 }
 0x480   : > { %v4319_v14 = vpop.eup %4318 }
 0x4aa   : > { %v3877_v11 = vpop.f32.mrb[10].mxu1 }
 0x4ab   : > { %v3827_v12 = vpop.f32.mrb[2].mxu0  ;;  %v1611_v13 = vpop.f32.mrb[11].mxu1  ;;  %v1617_v20 = vadd.f32 %v3877_v11, %v4727_v16 }
 0x4ac   : > { %v1612_v15 = vadd.f32 %v1611_v13, %v4732_v17  ;;  %v871_v18 = vpop.f32.mrb[3].mxu0 }
 0x4ad   : > { %v880_v19 = vmul.f32 %v4319_v14, %v871_v18  ;;  %v1623_v22 = vsel %vm778_vm4, %v1617_v20, -inf }
 0x4ae   : > { %v1620_v21 = vsel %vm778_vm4, %v1612_v15, -inf }
 0x4af   : > { %1621 = vmax.xlane.f32.xlu1 %v1620_v21 }
 0x4b3   : > { %1624 = vmax.xlane.f32.xlu1 %v1623_v22 }
 0x4da   : > { %v990_v24 = vpop.xlane.xlu1 %989 }
 0x4de   : > { %v1342_v25 = vpop.xlane.xlu1 %1341  ;;  %v987_v26 = vpop.xlane.xlu0 %986 }
 0x4df   : > { %v1344_v27 = vsub.f32 %v1334_v62, %v1342_v25 }
 0x4e1   : > { %v1347_v28 = vmul.f32 1.442695, %v1344_v27 }
 0x4e2   : > { %v1339_v29 = vpop.xlane.xlu0 %1338 }
 0x4e3   : > { %4320 = vpow2.f32 %v1347_v28  ;;  %v1343_v30 = vsub.f32 %v1329_v4, %v1339_v29 }
 0x4e5   : > { %v1345_v17 = vmul.f32 1.442695, %v1343_v30 }
 0x4e6   : > { %v4268_v34 = vpop.permute.xlu0 %4267 }
 0x4e7   : > { %4322 = vpow2.f32 %v1345_v17  ;;  %v4270_v39 = vunpack.i.h.bf16 %v4268_v34  ;;  %v4269_v41 = vunpack.i.l.bf16 %v4268_v34  ;;  %v404_v34 = vld [vmem:[%s4623_s12 + $0xa8] sm:$0xff] }
 0x4e8   : > { %4324 = vrcp.f32 %v990_v24 }
 0x4e9   : > { %4326 = vrcp.f32 %v987_v26  ;;  %v4079_v45 = vpack.c.bf16 %v4270_v39, %v4269_v41  ;;  %v380_v41 = vld [vmem:[%s5028_s1] sm:$0xff] }
 0x4ea   : > { %4328 = vrcp.f32 %v796_v23 }
 0x4ed   : > { %v4321_v31 = vpop.eup %4320 }
 0x4ee   : > { %v1352_v16 = vsel %vm778_vm4, %v4321_v31, 0.0 }
 0x4ef   : > { %1353 = vadd.xlane.f32.xlu1 %v1352_v16 }
 0x4f1   : > { %v4323_v32 = vpop.eup %4322 }
 0x4f2   : > { %v1349_v33 = vsel %vm778_vm4, %v4323_v32, 0.0  ;;  %v4325_v35 = vpop.eup %4324 }
 0x4f3   : > { %1350 = vadd.xlane.f32.xlu1 %v1349_v33  ;;  %v4327_v38 = vpop.eup %4326  ;;  %v403_v33 = vld [vmem:[%s4623_s12 + $0xa0] sm:$0xff] }
 0x504   : > { %4272 = vrot.lane.b32.xlu1 %v4694_v60, %s4488_s19  ;;  %v4329_v60 = vpop.eup %4328 }
 0x505   : > { %v881_v46 = vmul.f32 %v4329_v60, %v3827_v12  ;;  %v401_v60 = vld [vmem:[%s4623_s12 + $0x90] sm:$0xff] }
 0x525   : > { %v3841_v36 = vpop.f32.mrb[4].mxu0 }
 0x526   : > { %v1083_v42 = vmul.f32 %v4325_v35, %v3841_v36  ;;  %v1073_v43 = vpop.f32.mrb[5].mxu0  ;;  %v4101_v35 = vpack.c.bf16 %v404_v34, %v403_v33  ;;  %v405_v36 = vld [vmem:[%s4623_s12 + $0xb0] sm:$0xff] }
 0x527   : > { %v1082_v44 = vmul.f32 %v4327_v38, %v1073_v43  ;;  %v406_v38 = vld [vmem:[%s4623_s12 + $0xb8] sm:$0xff]  ;;  %v399_v43 = vld [vmem:[%s4623_s12 + $0x80] sm:$0xff] }
 0x528   : > { %v4105_v39 = vpack.c.bf16 %v406_v38, %v405_v36 }
 0x529   : > { %3844 = vmatprep.mubr.msk.f32.mxu0 %vm690_vm2, %v1082_v44  ;;  %v400_v44 = vld [vmem:[%s4623_s12 + $0x88] sm:$0xff] }
 0x52a   : > { %3845 = vmatmul.mubr.msk.f32.vlgmr.msra.gmra.mrb[6].mxu0 %vm690_vm2, %v1083_v42  ;;  %v381_v42 = vld [vmem:[%s5028_s1 + $0x8] sm:$0xff] }
 0x52b   : > { %3848 = vmatpush3.msra.mxu0 %v395_v10  ;;  %3849 = vmatprep.mubr.msk.f32.mxu0 %vm690_vm2, %v880_v19  ;;  %v398_v10 = vld [vmem:[%s4623_s12 + $0x78] sm:$0xff] }
 0x52c   : > { %4080 = vmatprep.subr.bf16.mxu0 %v4079_v45 }
 0x532   : > { %3850 = vmatmul.mubr.msk.f32.vlgmr.msra.gmra.mrb[6].mxu0 %vm690_vm2, %v881_v46  ;;  %v402_v46 = vld [vmem:[%s4623_s12 + $0x98] sm:$0xff] }
 0x533   : > { %4082 = vmatpush3.bf16.msra.mxu0 %v4079_v45  ;;  %3863 = vmatprep.mubr.msk.f32.mxu0 %vm778_vm4, %v4323_v32  ;;  %v4093_v45 = vpack.c.bf16 %v400_v44, %v399_v43 }
 0x534   : > { %3866 = vmatprep.subr.mxu0 %v397_v47 }
 0x535   : > { %4094 = vmatprep.subr.bf16.mxu1 %v4093_v45 }
 0x536   : > { %3864 = vmatmul.mubr.msk.f32.vlgmr.msra.gmra.mrb[8].mxu0 %vm778_vm4, %v4321_v31  ;;  %4096 = vmatpush3.bf16.msra.mxu1 %v4093_v45 }
 0x537   : > { %3867 = vmatpush3.msra.mxu0 %v397_v47  ;;  %v4097_v47 = vpack.c.bf16 %v402_v46, %v401_v60 }
 0x539   : > { %4098 = vmatprep.subr.bf16.mxu1 %v4097_v47 }
 0x53a   : > { %4100 = vmatpush3.bf16.msra.mxu1 %v4097_v47 }
 0x53c   : > { %v1622_v48 = vpop.xlane.xlu1 %1621 }
 0x53d   : > { %v1626_v49 = vsub.f32 %v1612_v15, %v1622_v48 }
 0x53f   : > { %v1628_v50 = vmul.f32 1.442695, %v1626_v49 }
 0x540   : > { %v1625_v51 = vpop.xlane.xlu1 %1624 }
 0x541   : > { %4330 = vpow2.f32 %v1628_v50  ;;  %v1627_v52 = vsub.f32 %v1617_v20, %v1625_v51 }
 0x543   : > { %v1630_v53 = vmul.f32 1.442695, %v1627_v52 }
 0x545   : > { %4332 = vpow2.f32 %v1630_v53 }
 0x54b   : > { %v4331_v54 = vpop.eup %4330 }
 0x54c   : > { %v1632_v55 = vsel %vm778_vm4, %v4331_v54, 0.0 }
 0x54d   : > { %1633 = vadd.xlane.f32.xlu0 %v1632_v55  ;;  %v1848_v55 = vsub.s32 3, %v4675_v37 }
 0x54f   : > { %v4333_v56 = vpop.eup %4332 }
 0x550   : > { %v1635_v57 = vsel %vm778_vm4, %v4333_v56, 0.0 }
 0x551   : > { %1636 = vadd.xlane.f32.xlu1 %v1635_v57 }
 0x57c   : > { %v1354_v58 = vpop.xlane.xlu1 %1353 }
 0x57d   : > { %4334 = vrcp.f32 %v1354_v58 }
 0x580   : > { %v1351_v59 = vpop.xlane.xlu1 %1350 }
 0x581   : > { %4336 = vrcp.f32 %v1351_v59  ;;  %v1849_v59 = vrot.slane %v4679_v40, %v1848_v55 }
 0x584   : > { %v4273_v61 = vpop.permute.xlu1 %4272 }
 0x585   : > { %v4275_v62 = vunpack.i.h.bf16 %v4273_v61  ;;  %v4274_v63 = vunpack.i.l.bf16 %v4273_v61 }
 0x587   : > { %v4089_v0 = vpack.c.bf16 %v4275_v62, %v4274_v63  ;;  %v4335_v4 = vpop.eup %4334 }
 0x589   : > { %4090 = vmatprep.subr.bf16.mxu0 %v4089_v0 }
 0x58b   : > { %v4337_v6 = vpop.eup %4336 }
 0x5da   : > { %v1634_v11 = vpop.xlane.xlu0 %1633 }
 0x5db   : > { %4338 = vrcp.f32 %v1634_v11  ;;  %v409_v11 = vld [vmem:[%s4623_s12 + $0xd0] sm:$0xff] }
 0x5de   : > { %v1637_v12 = vpop.xlane.xlu1 %1636 }
 0x5df   : > { %4340 = vrcp.f32 %v1637_v12 }
 0x5e5   : > { %v4339_v14 = vpop.eup %4338 }
 0x5e9   : > { %v4341_v18 = vpop.eup %4340 }
 0x609   : > { %v3865_v5 = vpop.f32.mrb[8].mxu0 }
 0x60a   : > { %v1445_v7 = vmul.f32 %v4335_v4, %v3865_v5  ;;  %v1435_v8 = vpop.f32.mrb[9].mxu0 }
 0x60b   : > { %v1444_v9 = vmul.f32 %v4337_v6, %v1435_v8 }
 0x60d   : > { %3868 = vmatprep.mubr.msk.f32.mxu0 %vm690_vm2, %v1444_v9  ;;  %v407_v9 = vld [vmem:[%s4623_s12 + $0xc0] sm:$0xff] }
 0x60e   : > { %3869 = vmatmul.mubr.msk.f32.vlgmr.msra.gmra.mrb[6].mxu0 %vm690_vm2, %v1445_v7 }
 0x60f   : > { %4092 = vmatpush3.bf16.msra.mxu0 %v4089_v0  ;;  %3882 = vmatprep.mubr.msk.f32.mxu0 %vm778_vm4, %v4331_v54  ;;  %v1842_v54 = vsub.s32 2, %v4675_v37 }
 0x610   : > { %3885 = vmatprep.subr.mxu0 %v398_v10 }
 0x612   : > { %3883 = vmatmul.mubr.msk.f32.vlgmr.msra.gmra.mrb[10].mxu0 %vm778_vm4, %v4333_v56  ;;  %v1843_v56 = vrot.slane %v4679_v40, %v1842_v54 }
 0x613   : > { %3886 = vmatpush3.msra.mxu0 %v398_v10  ;;  %v408_v10 = vld [vmem:[%s4623_s12 + $0xc8] sm:$0xff] }
 0x614   : > { %4102 = vmatprep.subr.bf16.mxu0 %v4101_v35  ;;  %v4109_v12 = vpack.c.bf16 %v408_v10, %v407_v9 }
 0x616   : > { %4110 = vmatprep.subr.bf16.mxu1 %v4109_v12 }
 0x6e5   : > { %v3884_v13 = vpop.f32.mrb[10].mxu0 }
 0x6e6   : > { %v1718_v15 = vpop.f32.mrb[11].mxu0  ;;  %v1728_v20 = vmul.f32 %v4341_v18, %v3884_v13  ;;  %v410_v13 = vld [vmem:[%s4623_s12 + $0xd8] sm:$0xff] }
 0x6e7   : > { %v1727_v19 = vmul.f32 %v4339_v14, %v1718_v15  ;;  %v4113_v14 = vpack.c.bf16 %v410_v13, %v409_v11 }
 0x6e9   : > { %3887 = vmatprep.mubr.msk.f32.mxu0 %vm690_vm2, %v1727_v19  ;;  %v4852_v19 = vld [vmem:[%s5030_s3 + $0x8] sm:$0xff] }
 0x6ea   : > { %3888 = vmatmul.mubr.msk.f32.vlgmr.msra.gmra.mrb[6].mxu0 %vm690_vm2, %v1728_v20  ;;  %v4857_v20 = vld [vmem:[%s5030_s3] sm:$0xff] }
 0x6eb   : > { %4104 = vmatpush3.bf16.msra.mxu0 %v4101_v35  ;;  %3909 = vmatprep.mubr.msk.f32.mxu0 %vm419_vm1, %v380_v41 }
 0x6ec   : > { %4106 = vmatprep.subr.bf16.mxu0 %v4105_v39 }
 0x6ef   : > { %4108 = vmatpush3.bf16.msra.mxu0 %v4105_v39 }
 0x6f2   : > { %3910 = vmatmul.mubr.msk.f32.vlgmr.msra.gmra.mrb[12].mxu0 %vm419_vm1, %v381_v42 }
 0x7bd   : > { %v3889_v21 = vpop.f32.mrb[6].mxu0 }
 0x7be   : > { %v1801_v22 = vpop.f32.mrb[7].mxu0  ;;  %v4797_v24 = vadd.f32 %v3889_v21, %v4655_v3 }
 0x7bf   : > { %v4794_v23 = vadd.f32 %v1801_v22, %v4653_v2 }
 0x7c0   : > { %v1817_v26 = vsel %vm419_vm1, %v4797_v24, 0.0 }
 0x7c1   : > { %v1814_v25 = vsel %vm419_vm1, %v4794_v23, 0.0 }
 0x7c2   : > { %1815 = vadd.xlane.f32.xlu0 %v1814_v25 }
 0x7c5   : > { %v3911_v6 = vpop.f32.mrb[12].mxu0 }
 0x7c6   : > { %1818 = vadd.xlane.f32.xlu0 %v1817_v26  ;;  %v2005_v7 = vpop.f32.mrb[13].mxu0 }
 0x7c7   : > { %v4117_v8 = vpack.c.bf16 %v3911_v6, %v2005_v7  ;;  %v4830_v40 = vpack.i.bf16 %v3911_v6, %v2005_v7 }
 0x7c9   : > { %4119 = vmatprep.subr.msk.bf16.mxu0 %vm4699_vm3, %v4117_v8 }
 0x7ca   : > { %4122 = vmatpush3.bf16.xpose.msk.msra.mxu0 %vm4699_vm3, %v4117_v8 }
 0x84f   : > { %v1816_v27 = vpop.xlane.xlu0 %1815 }
 0x850   : > { %v1820_v28 = vmul.f32 0.03125, %v1816_v27 }
 0x852   : > { %v1822_v29 = vsub.f32 %v4794_v23, %v1820_v28 }
 0x853   : > { %v1819_v2 = vpop.xlane.xlu0 %1818 }
 0x854   : > { %v1821_v30 = vmul.f32 0.03125, %v1819_v2  ;;  %v1824_v3 = vmul.f32 %v1822_v29, %v1822_v29 }
 0x856   : > { %v1823_v17 = vsub.f32 %v4797_v24, %v1821_v30  ;;  %v1826_v31 = vsel %vm419_vm1, %v1824_v3, 0.0 }
 0x857   : > { %1827 = vadd.xlane.f32.xlu0 %v1826_v31 }
 0x858   : > { %v1825_v16 = vmul.f32 %v1823_v17, %v1823_v17 }
 0x85a   : > { %v1829_v32 = vsel %vm419_vm1, %v1825_v16, 0.0 }
 0x85b   : > { %1830 = vadd.xlane.f32.xlu0 %v1829_v32 }
 0x8e4   : > { %v1828_v48 = vpop.xlane.xlu0 %1827 }
 0x8e5   : > { %v1832_v49 = vmul.f32 0.03125, %v1828_v48 }
 0x8e7   : > { %v1834_v50 = vadd.f32 1e-05, %v1832_v49 }
 0x8e8   : > { %v1831_v51 = vpop.xlane.xlu0 %1830 }
 0x8e9   : > { %4342 = vrsqrt.f32 %v1834_v50  ;;  %v1833_v52 = vmul.f32 0.03125, %v1831_v51 }
 0x8eb   : > { %v1835_v53 = vadd.f32 1e-05, %v1833_v52 }
 0x8ed   : > { %4344 = vrsqrt.f32 %v1835_v53 }
 0x8f3   : > { %v4343_v57 = vpop.eup %4342 }
 0x8f4   : > { %v1838_v58 = vmul.f32 %v4343_v57, %v1822_v29 }
 0x8f6   : > { %v1844_v61 = vmul.f32 %v1843_v56, %v1838_v58 }
 0x8f7   : > { %v4345_v62 = vpop.eup %4344 }
 0x8f8   : > { %v1839_v63 = vmul.f32 %v4345_v62, %v1823_v17  ;;  %v1850_v0 = vadd.f32 %v1849_v59, %v1844_v61 }
 0x8fa   : > { %v1845_v4 = vmul.f32 %v1843_v56, %v1839_v63  ;;  %3898 = vmatprep.mubr.msk.f32.mxu1 %vm419_vm1, %v1850_v0 }
 0x8fc   : > { %v1851_v5 = vadd.f32 %v1849_v59, %v1845_v4 }
 0x8fe   : > { %3899 = vmatmul.mubr.msk.f32.vlgmr.msra.gmra.mrb[12].mxu1 %vm419_vm1, %v1851_v5 }
 0x8ff   : > { %3920 = vmatprep.mubr.msk.f32.mxu1 %vm419_vm1, %v380_v41  ;;  %4112 = vmatpush3.bf16.msra.mxu1 %v4109_v12 }
 0x900   : > { %4114 = vmatprep.subr.bf16.mxu1 %v4113_v14 }
 0x903   : > { %4116 = vmatpush3.bf16.msra.mxu1 %v4113_v14 }
 0x906   : > { %3921 = vmatmul.mubr.msk.f32.vlgmr.msra.gmra.mrb[14].mxu1 %vm419_vm1, %v381_v42 }
 0x9d1   : > { %v4841_v15 = vpop.f32.mrb[12].mxu1 }
 0x9d2   : > { %v4843_v18 = vpop.f32.mrb[13].mxu1 }
 0x9d3   : > { %3927 = vmatprep.mubr.msk.f32.mxu0 %vm690_vm2, %v4843_v18 }
 0x9d4   : > { %3928 = vmatmul.mubr.msk.f32.vlgmr.msra.gmra.mrb[14].mxu0 %vm690_vm2, %v4841_v15 }
 0x9d9   : > { %v3922_v29 = vpop.f32.mrb[14].mxu1 }
 0x9da   : > { %v2080_v2 = vpop.f32.mrb[15].mxu1 }
 0x9db   : > { %v4123_v30 = vpack.c.bf16 %v3922_v29, %v2080_v2  ;;  %v4865_v3 = vpack.i.bf16 %v3922_v29, %v2080_v2  ;;  %v412_v2 = vld [vmem:[%s4623_s12 + $0xe8] sm:$0xff] }
 0x9dd   : > { %4124 = vmatprep.subr.bf16.mxu1 %v4123_v30 }
 0x9de   : > { %4126 = vmatpush3.bf16.msra.mxu1 %v4123_v30  ;;  %v411_v30 = vld [vmem:[%s4623_s12 + $0xe0] sm:$0xff] }
 0xaa7   : > { %v3929_v21 = vpop.f32.mrb[14].mxu0 }
 0xaa8   : > { %v2173_v22 = vadd.f32 %v3929_v21, %v4852_v19  ;;  %v2167_v25 = vpop.f32.mrb[15].mxu0 }
 0xaa9   : > { %v2168_v26 = vadd.f32 %v2167_v25, %v4857_v20 }
 0xaaa   : > { %v2179_v27 = vsel %vm778_vm4, %v2173_v22, -inf }
 0xaab   : > { %2180 = vmax.xlane.f32.xlu1 %v2179_v27  ;;  %v2176_v28 = vsel %vm778_vm4, %v2168_v26, -inf }
 0xaac   : > { %2177 = vmax.xlane.f32.xlu0 %v2176_v28 }
 0xabc   : > { %2279 = vrot.lane.b32.xlu1 %v4843_v18, %s4486_s20 }
 0xac0   : > { %2281 = vrot.lane.b32.xlu1 %v4841_v15, %s4486_s20 }
 0xac2   : > { %4277 = vrot.lane.b32.xlu0 %v4830_v40, %s4486_s20 }
 0xac4   : > { %4282 = vrot.lane.b32.xlu1 %v4830_v40, %s4487_s30 }
 0xac6   : > { %2643 = vrot.lane.b32.xlu0 %v4843_v18, %s4487_s30 }
 0xac8   : > { %2645 = vrot.lane.b32.xlu1 %v4841_v15, %s4487_s30 }
 0xb38   : > { %v2181_v17 = vpop.xlane.xlu1 %2180 }
 0xb39   : > { %v2183_v31 = vsub.f32 %v2173_v22, %v2181_v17  ;;  %v2178_v16 = vpop.xlane.xlu0 %2177 }
 0xb3a   : > { %v2182_v32 = vsub.f32 %v2168_v26, %v2178_v16 }
 0xb3b   : > { %v2186_v33 = vmul.f32 1.442695, %v2183_v31 }
 0xb3c   : > { %v2184_v34 = vmul.f32 1.442695, %v2182_v32  ;;  %v2280_v35 = vpop.permute.xlu1 %2279 }
 0xb3d   : > { %v4278_v36 = vpop.permute.xlu0 %4277 }
 0xb3e   : > { %4346 = vpow2.f32 %v2184_v34  ;;  %v4280_v38 = vunpack.i.h.bf16 %v4278_v36  ;;  %v4279_v39 = vunpack.i.l.bf16 %v4278_v36 }
 0xb3f   : > { %4348 = vpow2.f32 %v2186_v33 }
 0xb40   : > { %v4127_v41 = vpack.c.bf16 %v4280_v38, %v4279_v39  ;;  %v2282_v42 = vpop.permute.xlu1 %2281 }
 0xb41   : > { %v2644_v48 = vpop.permute.xlu0 %2643 }
 0xb42   : > { %4129 = vmatprep.subr.msk.bf16.mxu1 %vm4699_vm3, %v4127_v41 }
 0xb44   : > { %v4283_v43 = vpop.permute.xlu1 %4282 }
 0xb45   : > { %v4285_v44 = vunpack.i.h.bf16 %v4283_v43  ;;  %v4284_v45 = vunpack.i.l.bf16 %v4283_v43 }
 0xb47   : > { %v4137_v47 = vpack.c.bf16 %v4285_v44, %v4284_v45 }
 0xb48   : > { %v4347_v60 = vpop.eup %4346  ;;  %v2646_v49 = vpop.permute.xlu1 %2645 }
 0xb49   : > { %v4349_v46 = vpop.eup %4348  ;;  %3934 = vmatprep.mubr.msk.f32.mxu1 %vm778_vm4, %v4347_v60  ;;  %v2188_v61 = vsel %vm778_vm4, %v4347_v60, 0.0 }
 0xb4a   : > { %3935 = vmatmul.mubr.msk.f32.vlgmr.msra.gmra.mrb[16].mxu1 %vm778_vm4, %v4349_v46  ;;  %v2191_v62 = vsel %vm778_vm4, %v4349_v46, 0.0 }
 0xb4b   : > { %4132 = vmatpush3.bf16.xpose.msk.msra.mxu1 %vm4699_vm3, %v4127_v41  ;;  %3941 = vmatprep.mubr.msk.f32.mxu1 %vm690_vm2, %v2280_v35 }
 0xb4c   : > { %4139 = vmatprep.subr.msk.bf16.mxu1 %vm4699_vm3, %v4137_v47 }
 0xb52   : > { %3942 = vmatmul.mubr.msk.f32.vlgmr.msra.gmra.mrb[18].mxu1 %vm690_vm2, %v2282_v42 }
 0xb53   : > { %4142 = vmatpush3.bf16.xpose.msk.msra.mxu1 %vm4699_vm3, %v4137_v47  ;;  %3965 = vmatprep.mubr.msk.f32.mxu1 %vm690_vm2, %v2644_v48 }
 0xb5a   : > { %3966 = vmatmul.mubr.msk.f32.vlgmr.msra.gmra.mrb[20].mxu1 %vm690_vm2, %v2646_v49 }
 0xc1d   : > { %v4891_v50 = vpop.f32.mrb[16].mxu1 }
 0xc1e   : > { %v4893_v51 = vpop.f32.mrb[17].mxu1 }
 0xc25   : > { %v3943_v52 = vpop.f32.mrb[18].mxu1 }
 0xc26   : > { %v2367_v53 = vadd.f32 %v3943_v52, %v4852_v19  ;;  %v2361_v54 = vpop.f32.mrb[19].mxu1 }
 0xc27   : > { %v2362_v55 = vadd.f32 %v2361_v54, %v4857_v20 }
 0xc28   : > { %v2373_v56 = vsel %vm778_vm4, %v2367_v53, -inf }
 0xc29   : > { %2374 = vmax.xlane.f32.xlu1 %v2373_v56  ;;  %v2370_v57 = vsel %vm778_vm4, %v2362_v55, -inf }
 0xc2a   : > { %2371 = vmax.xlane.f32.xlu0 %v2370_v57 }
 0xc2d   : > { %v3967_v58 = vpop.f32.mrb[20].mxu1 }
 0xc2e   : > { %v2725_v59 = vpop.f32.mrb[21].mxu1  ;;  %v2731_v22 = vadd.f32 %v3967_v58, %v4852_v19 }
 0xc2f   : > { %v2726_v26 = vadd.f32 %v2725_v59, %v4857_v20 }
 0xc30   : > { %v2737_v28 = vsel %vm778_vm4, %v2731_v22, -inf }
 0xc31   : > { %v2734_v29 = vsel %vm778_vm4, %v2726_v26, -inf }
 0xc3a   : > { %4292 = vrot.lane.b32.xlu1 %v4830_v40, %s4488_s19 }
 0xc3e   : > { %2928 = vrot.lane.b32.xlu1 %v4841_v15, %s4488_s19 }
 0xc40   : > { %4287 = vrot.lane.b32.xlu0 %v4865_v3, %s4486_s20 }
 0xc44   : > { %2926 = vrot.lane.b32.xlu0 %v4843_v18, %s4488_s19 }
 0xc63   : > { %2189 = vadd.xlane.f32.xlu0 %v2188_v61 }
 0xc67   : > { %2192 = vadd.xlane.f32.xlu0 %v2191_v62 }
 0xcb6   : > { %v2375_v63 = vpop.xlane.xlu1 %2374 }
 0xcb7   : > { %v2377_v0 = vsub.f32 %v2367_v53, %v2375_v63  ;;  %v2372_v4 = vpop.xlane.xlu0 %2371 }
 0xcb8   : > { %v2376_v5 = vsub.f32 %v2362_v55, %v2372_v4 }
 0xcb9   : > { %v2380_v6 = vmul.f32 1.442695, %v2377_v0  ;;  %v413_v0 = vld [vmem:[%s4623_s12 + $0xf0] sm:$0xff] }
 0xcba   : > { %v2378_v7 = vmul.f32 1.442695, %v2376_v5  ;;  %v4293_v8 = vpop.permute.xlu1 %4292 }
 0xcbb   : > { %4350 = vpow2.f32 %v2380_v6  ;;  %v4295_v40 = vunpack.i.h.bf16 %v4293_v8  ;;  %v4294_v9 = vunpack.i.l.bf16 %v4293_v8  ;;  %v4288_v10 = vpop.permute.xlu0 %4287 }
 0xcbc   : > { %4352 = vpow2.f32 %v2378_v7  ;;  %v4290_v11 = vunpack.i.h.bf16 %v4288_v10  ;;  %v4289_v12 = vunpack.i.l.bf16 %v4288_v10 }
 0xcbd   : > { %v4147_v13 = vpack.c.bf16 %v4295_v40, %v4294_v9 }
 0xcbe   : > { %v4133_v14 = vpack.c.bf16 %v4290_v11, %v4289_v12  ;;  %v2929_v27 = vpop.permute.xlu1 %2928 }
 0xcbf   : > { %4149 = vmatprep.subr.msk.bf16.mxu1 %vm4699_vm3, %v4147_v13  ;;  %v2927_v15 = vpop.permute.xlu0 %2926 }
 0xcc0   : > { %4134 = vmatprep.subr.bf16.mxu0 %v4133_v14  ;;  %4152 = vmatpush3.bf16.xpose.msk.msra.mxu1 %vm4699_vm3, %v4147_v13 }
 0xcc1   : > { %3984 = vmatprep.mubr.msk.f32.mxu1 %vm690_vm2, %v2927_v15  ;;  %4136 = vmatpush3.bf16.msra.mxu0 %v4133_v14 }
 0xcc2   : > { %3951 = vmatprep.subr.mxu0 %v412_v2 }
 0xcc5   : > { %v4351_v18 = vpop.eup %4350 }
 0xcc6   : > { %v4353_v21 = vpop.eup %4352  ;;  %v2385_v25 = vsel %vm778_vm4, %v4351_v18, 0.0 }
 0xcc7   : > { %2386 = vadd.xlane.f32.xlu1 %v2385_v25  ;;  %3948 = vmatprep.mubr.msk.f32.mxu0 %vm778_vm4, %v4353_v21  ;;  %v2382_v1 = vsel %vm778_vm4, %v4353_v21, 0.0 }
 0xcc8   : > { %3985 = vmatmul.mubr.msk.f32.vlgmr.msra.gmra.mrb[22].mxu1 %vm690_vm2, %v2929_v27  ;;  %2383 = vadd.xlane.f32.xlu0 %v2382_v1 }
 0xcc9   : > { %3949 = vmatmul.mubr.msk.f32.vlgmr.msra.gmra.mrb[16].mxu0 %vm778_vm4, %v4351_v18 }
 0xcca   : > { %3952 = vmatpush3.msra.mxu0 %v412_v2 }
 0xccb   : > { %2738 = vmax.xlane.f32.xlu1 %v2737_v28  ;;  %3956 = vmatprep.subr.mxu0 %v411_v30  ;;  %v414_v28 = vld [vmem:[%s4623_s12 + $0xf8] sm:$0xff] }
 0xccc   : > { %2735 = vmax.xlane.f32.xlu0 %v2734_v29 }
 0xce2   : > { %4297 = vrot.lane.b32.xlu0 %v4865_v3, %s4487_s30 }
 0xcf0   : > { %v2190_v17 = vpop.xlane.xlu0 %2189 }
 0xcf1   : > { %4354 = vrcp.f32 %v2190_v17 }
 0xcf4   : > { %v2193_v31 = vpop.xlane.xlu0 %2192 }
 0xcfb   : > { %v4355_v43 = vpop.eup %4354 }
 0xcfc   : > { %v2277_v57 = vmul.f32 %v4355_v43, %v4893_v51 }
 0xd54   : > { %v2387_v16 = vpop.xlane.xlu1 %2386 }
 0xd55   : > { %v2384_v32 = vpop.xlane.xlu0 %2383 }
 0xd56   : > { %4356 = vrcp.f32 %v2384_v32 }
 0xd57   : > { %4358 = vrcp.f32 %v2387_v16 }
 0xd58   : > { %v2739_v33 = vpop.xlane.xlu1 %2738  ;;  %4360 = vrcp.f32 %v2193_v31 }
 0xd59   : > { %v2741_v34 = vsub.f32 %v2731_v22, %v2739_v33  ;;  %v2736_v35 = vpop.xlane.xlu0 %2735 }
 0xd5a   : > { %v2740_v38 = vsub.f32 %v2726_v26, %v2736_v35 }
 0xd5b   : > { %v2744_v36 = vmul.f32 1.442695, %v2741_v34 }
 0xd5c   : > { %v2742_v39 = vmul.f32 1.442695, %v2740_v38 }
 0xd5d   : > { %4362 = vpow2.f32 %v2744_v36  ;;  %v4298_v41 = vpop.permute.xlu0 %4297 }
 0xd5e   : > { %v4300_v46 = vunpack.i.h.bf16 %v4298_v41  ;;  %v4299_v47 = vunpack.i.l.bf16 %v4298_v41  ;;  %4364 = vpow2.f32 %v2742_v39 }
 0xd60   : > { %v4357_v60 = vpop.eup %4356  ;;  %v4143_v58 = vpack.c.bf16 %v4300_v46, %v4299_v47 }
 0xd61   : > { %v4359_v52 = vpop.eup %4358 }
 0xd9b   : > { %v3986_v42 = vpop.f32.mrb[22].mxu1 }
 0xd9c   : > { %v3950_v44 = vpop.f32.mrb[16].mxu0  ;;  %v3008_v45 = vpop.f32.mrb[23].mxu1  ;;  %v3014_v54 = vadd.f32 %v3986_v42, %v4852_v19 }
 0xd9d   : > { %v3009_v48 = vadd.f32 %v3008_v45, %v4857_v20  ;;  %v2470_v49 = vpop.f32.mrb[17].mxu0  ;;  %v2480_v55 = vmul.f32 %v4359_v52, %v3950_v44  ;;  %v4361_v20 = vpop.eup %4360  ;;  %v3250_v52 = vld [vmem:[%s4639_s18 + $0x8] sm:$0xff] }
 0xd9e   : > { %v2479_v53 = vmul.f32 %v4357_v60, %v2470_v49  ;;  %v3020_v59 = vsel %vm778_vm4, %v3014_v54, -inf  ;;  %v4363_v19 = vpop.eup %4362  ;;  %v2278_v61 = vmul.f32 %v4361_v20, %v4891_v50  ;;  %v3249_v49 = vld [vmem:[%s4639_s18] sm:$0xff] }
 0xd9f   : > { %v3017_v56 = vsel %vm778_vm4, %v3009_v48, -inf  ;;  %v2749_v62 = vsel %vm778_vm4, %v4363_v19, 0.0  ;;  %v4365_v63 = vpop.eup %4364 }
 0xda0   : > { %3018 = vmax.xlane.f32.xlu1 %v3017_v56  ;;  %3953 = vmatprep.mubr.msk.f32.mxu0 %vm690_vm2, %v2479_v53  ;;  %v2746_v51 = vsel %vm778_vm4, %v4365_v63, 0.0  ;;  %v4157_v53 = vpack.c.bf16 %v3250_v52, %v3249_v49 }
 0xda1   : > { %3954 = vmatmul.mubr.msk.f32.vlgmr.msra.gmra.mrb[18].mxu0 %vm690_vm2, %v2480_v55  ;;  %v3252_v55 = vld [vmem:[%s4639_s18 + $0x18] sm:$0xff] }
 0xda2   : > { %3957 = vmatpush3.msra.mxu0 %v411_v30  ;;  %3958 = vmatprep.mubr.msk.f32.mxu0 %vm690_vm2, %v2277_v57 }
 0xda3   : > { %4144 = vmatprep.subr.bf16.mxu0 %v4143_v58  ;;  %4158 = vmatprep.subr.bf16.mxu1 %v4157_v53 }
 0xda4   : > { %3021 = vmax.xlane.f32.xlu1 %v3020_v59  ;;  %4160 = vmatpush3.bf16.msra.mxu1 %v4157_v53 }
 0xda8   : > { %2750 = vadd.xlane.f32.xlu1 %v2749_v62  ;;  %v3239_v62 = vsub.s32 4, %v4675_v37 }
 0xda9   : > { %3959 = vmatmul.mubr.msk.f32.vlgmr.msra.gmra.mrb[18].mxu0 %vm690_vm2, %v2278_v61 }
 0xdaa   : > { %4146 = vmatpush3.bf16.msra.mxu0 %v4143_v58  ;;  %3972 = vmatprep.mubr.msk.f32.mxu0 %vm778_vm4, %v4365_v63  ;;  %v3245_v63 = vsub.s32 5, %v4675_v37  ;;  %v3344_v37 = vld [vmem:[%s4644_s25] sm:$0xff] }
 0xdab   : > { %3975 = vmatprep.subr.mxu0 %v413_v0 }
 0xdac   : > { %2747 = vadd.xlane.f32.xlu1 %v2746_v51  ;;  %v4386_v51 = vld [vmem:[%s4634_s16] sm:$0x3f] }
 0xdad   : > { %3973 = vmatmul.mubr.msk.f32.vlgmr.msra.gmra.mrb[20].mxu0 %vm778_vm4, %v4363_v19 }
 0xdae   : > { %3976 = vmatpush3.msra.mxu0 %v413_v0  ;;  %v3240_v0 = vrot.slane %v4386_v51, %v3239_v62 }
 0xdbd   : > { %4302 = vrot.lane.b32.xlu1 %v4865_v3, %s4488_s19 }
 0xe2d   : > { %v3019_v50 = vpop.xlane.xlu1 %3018 }
 0xe2e   : > { %v3023_v4 = vsub.f32 %v3009_v48, %v3019_v50 }
 0xe30   : > { %v3025_v5 = vmul.f32 1.442695, %v3023_v4 }
 0xe31   : > { %v3022_v6 = vpop.xlane.xlu1 %3021 }
 0xe32   : > { %4366 = vpow2.f32 %v3025_v5  ;;  %v3024_v7 = vsub.f32 %v3014_v54, %v3022_v6  ;;  %v3251_v54 = vld [vmem:[%s4639_s18 + $0x10] sm:$0xff]  ;;  %v3246_v5 = vrot.slane %v4386_v51, %v3245_v63 }
 0xe33   : > { %v4161_v56 = vpack.c.bf16 %v3252_v55, %v3251_v54 }
 0xe34   : > { %v3027_v8 = vmul.f32 1.442695, %v3024_v7 }
 0xe35   : > { %v2751_v40 = vpop.xlane.xlu1 %2750  ;;  %4162 = vmatprep.subr.bf16.mxu1 %v4161_v56 }
 0xe36   : > { %4368 = vpow2.f32 %v3027_v8  ;;  %4164 = vmatpush3.bf16.msra.mxu1 %v4161_v56 }
 0xe37   : > { %4370 = vrcp.f32 %v2751_v40 }
 0xe39   : > { %v2748_v9 = vpop.xlane.xlu1 %2747 }
 0xe3a   : > { %4372 = vrcp.f32 %v2748_v9 }
 0xe3c   : > { %v4367_v10 = vpop.eup %4366 }
 0xe3d   : > { %v4303_v11 = vpop.permute.xlu1 %4302  ;;  %v3029_v12 = vsel %vm778_vm4, %v4367_v10, 0.0 }
 0xe3e   : > { %v4305_v13 = vunpack.i.h.bf16 %v4303_v11  ;;  %v4304_v14 = vunpack.i.l.bf16 %v4303_v11  ;;  %3030 = vadd.xlane.f32.xlu0 %v3029_v12  ;;  %v3345_v11 = vld [vmem:[%s4644_s25 + $0x8] sm:$0xff] }
 0xe3f   : > { %v4165_v12 = vpack.c.bf16 %v3345_v11, %v3344_v37 }
 0xe40   : > { %v4369_v3 = vpop.eup %4368  ;;  %v4153_v15 = vpack.c.bf16 %v4305_v13, %v4304_v14  ;;  %v3346_v13 = vld [vmem:[%s4644_s25 + $0x10] sm:$0xff]  ;;  %v3347_v14 = vld [vmem:[%s4644_s25 + $0x18] sm:$0xff] }
 0xe41   : > { %v3032_v18 = vsel %vm778_vm4, %v4369_v3, 0.0  ;;  %v4371_v21 = vpop.eup %4370 }
 0xe42   : > { %3033 = vadd.xlane.f32.xlu1 %v3032_v18  ;;  %4154 = vmatprep.subr.bf16.mxu0 %v4153_v15  ;;  %v3349_v18 = vld [vmem:[%s4644_s25 + $0x28] sm:$0xff] }
 0xe44   : > { %v4373_v25 = vpop.eup %4372 }
 0xe80   : > { %v3974_v22 = vpop.f32.mrb[20].mxu0 }
 0xe81   : > { %v2842_v26 = vmul.f32 %v4371_v21, %v3974_v22  ;;  %v2832_v27 = vpop.f32.mrb[21].mxu0  ;;  %v3350_v22 = vld [vmem:[%s4644_s25 + $0x30] sm:$0xff] }
 0xe82   : > { %v2841_v1 = vmul.f32 %v4373_v25, %v2832_v27  ;;  %v3351_v25 = vld [vmem:[%s4644_s25 + $0x38] sm:$0xff] }
 0xe84   : > { %3977 = vmatprep.mubr.msk.f32.mxu0 %vm690_vm2, %v2841_v1 }
 0xe85   : > { %3978 = vmatmul.mubr.msk.f32.vlgmr.msra.gmra.mrb[18].mxu0 %vm690_vm2, %v2842_v26  ;;  %v4177_v26 = vpack.c.bf16 %v3351_v25, %v3350_v22 }
 0xe86   : > { %4156 = vmatpush3.bf16.msra.mxu0 %v4153_v15  ;;  %3991 = vmatprep.mubr.msk.f32.mxu0 %vm778_vm4, %v4367_v10  ;;  %v3348_v15 = vld [vmem:[%s4644_s25 + $0x20] sm:$0xff] }
 0xe87   : > { %3994 = vmatprep.subr.mxu0 %v414_v28  ;;  %v4173_v21 = vpack.c.bf16 %v3349_v18, %v3348_v15 }
 0xe89   : > { %3992 = vmatmul.mubr.msk.f32.vlgmr.msra.gmra.mrb[22].mxu0 %vm778_vm4, %v4369_v3  ;;  %v4169_v3 = vpack.c.bf16 %v3347_v14, %v3346_v13 }
 0xe8a   : > { %3995 = vmatpush3.msra.mxu0 %v414_v28 }
 0xe8b   : > { %4166 = vmatprep.subr.bf16.mxu0 %v4165_v12 }
 0xecb   : > { %v3031_v29 = vpop.xlane.xlu0 %3030 }
 0xecc   : > { %4374 = vrcp.f32 %v3031_v29 }
 0xecf   : > { %v3034_v2 = vpop.xlane.xlu1 %3033 }
 0xed0   : > { %4376 = vrcp.f32 %v3034_v2 }
 0xed6   : > { %v4375_v17 = vpop.eup %4374 }
 0xeda   : > { %v4377_v16 = vpop.eup %4376 }
 0xf5c   : > { %v3993_v30 = vpop.f32.mrb[22].mxu0 }
 0xf5d   : > { %v3115_v31 = vpop.f32.mrb[23].mxu0  ;;  %v3125_v33 = vmul.f32 %v4377_v16, %v3993_v30 }
 0xf5e   : > { %v3124_v32 = vmul.f32 %v4375_v17, %v3115_v31 }
 0xf60   : > { %3996 = vmatprep.mubr.msk.f32.mxu0 %vm690_vm2, %v3124_v32 }
 0xf61   : > { %3997 = vmatmul.mubr.msk.f32.vlgmr.msra.gmra.mrb[18].mxu0 %vm690_vm2, %v3125_v33 }
 0xf62   : > { %4168 = vmatpush3.bf16.msra.mxu0 %v4165_v12 }
 0xf63   : > { %4170 = vmatprep.subr.bf16.mxu0 %v4169_v3 }
 0xf66   : > { %4172 = vmatpush3.bf16.msra.mxu0 %v4169_v3 }
 0xf67   : > { %4174 = vmatprep.subr.bf16.mxu0 %v4173_v21 }
 0xf6a   : > { %4176 = vmatpush3.bf16.msra.mxu0 %v4173_v21 }
 0xf6b   : > { %4178 = vmatprep.subr.bf16.mxu0 %v4177_v26 }
 0xf6e   : > { %4180 = vmatpush3.bf16.msra.mxu0 %v4177_v26 }
0x1034   : > { %v3998_v34 = vpop.f32.mrb[18].mxu0 }
0x1035   : > { %v3198_v35 = vpop.f32.mrb[19].mxu0  ;;  %v4957_v38 = vadd.f32 %v3998_v34, %v4797_v24 }
0x1036   : > { %v4954_v36 = vadd.f32 %v3198_v35, %v4794_v23 }
0x1037   : > { %v3214_v41 = vsel %vm419_vm1, %v4957_v38, 0.0 }
0x1038   : > { %v3211_v39 = vsel %vm419_vm1, %v4954_v36, 0.0 }
0x1039   : > { %3212 = vadd.xlane.f32.xlu0 %v3211_v39 }
0x103d   : > { %3215 = vadd.xlane.f32.xlu0 %v3214_v41 }
0x10c6   : > { %v3213_v42 = vpop.xlane.xlu0 %3212 }
0x10c7   : > { %v3217_v43 = vmul.f32 0.03125, %v3213_v42 }
0x10c9   : > { %v3219_v44 = vsub.f32 %v4954_v36, %v3217_v43 }
0x10ca   : > { %v3216_v23 = vpop.xlane.xlu0 %3215 }
0x10cb   : > { %v3218_v45 = vmul.f32 0.03125, %v3216_v23  ;;  %v3221_v24 = vmul.f32 %v3219_v44, %v3219_v44 }
0x10cd   : > { %v3220_v60 = vsub.f32 %v4957_v38, %v3218_v45  ;;  %v3223_v46 = vsel %vm419_vm1, %v3221_v24, 0.0 }
0x10ce   : > { %3224 = vadd.xlane.f32.xlu0 %v3223_v46 }
0x10cf   : > { %v3222_v47 = vmul.f32 %v3220_v60, %v3220_v60 }
0x10d1   : > { %v3226_v48 = vsel %vm419_vm1, %v3222_v47, 0.0 }
0x10d2   : > { %3227 = vadd.xlane.f32.xlu0 %v3226_v48 }
0x115b   : > { %v3225_v57 = vpop.xlane.xlu0 %3224 }
0x115c   : > { %v3229_v58 = vmul.f32 0.03125, %v3225_v57 }
0x115e   : > { %v3231_v20 = vadd.f32 1e-05, %v3229_v58 }
0x115f   : > { %v3228_v59 = vpop.xlane.xlu0 %3227 }
0x1160   : > { %4378 = vrsqrt.f32 %v3231_v20  ;;  %v3230_v19 = vmul.f32 0.03125, %v3228_v59 }
0x1162   : > { %v3232_v61 = vadd.f32 1e-05, %v3230_v19 }
0x1164   : > { %4380 = vrsqrt.f32 %v3232_v61 }
0x116a   : > { %v4379_v50 = vpop.eup %4378 }
0x116b   : > { %v3235_v4 = vmul.f32 %v4379_v50, %v3219_v44 }
0x116d   : > { %v3241_v6 = vmul.f32 %v3240_v0, %v3235_v4 }
0x116e   : > { %v4381_v7 = vpop.eup %4380 }
0x116f   : > { %v3236_v8 = vmul.f32 %v4381_v7, %v3220_v60  ;;  %v3247_v40 = vadd.f32 %v3246_v5, %v3241_v6 }
0x1171   : > { %v3242_v9 = vmul.f32 %v3240_v0, %v3236_v8  ;;  %4007 = vmatprep.mubr.msk.f32.mxu1 %vm419_vm1, %v3247_v40 }
0x1173   : > { %v3248_v10 = vadd.f32 %v3246_v5, %v3242_v9 }
0x1175   : > { %4008 = vmatmul.mubr.msk.f32.vlgmr.msra.gmra.mrb[24].mxu1 %vm419_vm1, %v3248_v10 }
0x1248   : > { %v4009_v27 = vpop.f32.mrb[24].mxu1 }
0x1249   : > { %v3337_v1 = vmul.f32 0.70710677, %v4009_v27  ;;  %v3325_v28 = vpop.f32.mrb[25].mxu1  ;;  %v3335_v32 = vmul.f32 0.5, %v4009_v27 }
0x124a   : > { %v3336_v29 = vmul.f32 0.70710677, %v3325_v28  ;;  %v3334_v31 = vmul.f32 0.5, %v3325_v28 }
0x124b   : > { %4382 = verf.f32 %v3337_v1 }
0x124c   : > { %4384 = verf.f32 %v3336_v29 }
0x1255   : > { %v4383_v2 = vpop.eup %4382 }
0x1256   : > { %v4385_v30 = vpop.eup %4384  ;;  %v3341_v17 = vadd.f32 1.0, %v4383_v2 }
0x1257   : > { %v3340_v16 = vadd.f32 1.0, %v4385_v30 }
0x1258   : > { %v3343_v34 = vmul.f32 %v3341_v17, %v3335_v32 }
0x1259   : > { %v3342_v33 = vmul.f32 %v3340_v16, %v3334_v31 }
0x125b   : > { %4026 = vmatprep.mubr.msk.f32.mxu0 %vm3352_vm5, %v3342_v33 }
0x125c   : > { %4027 = vmatmul.mubr.msk.f32.vlgmr.msra.gmra.mrb[24].mxu0 %vm3352_vm5, %v3343_v34 }
0x132d   : > { %3441 = sbr.rel (%p3633_p8) target bundleno = 4916 (0x1334), region = 64 }
0x132f   : > { %v4028_v35 = vpop.f32.mrb[24].mxu0 }
0x1330   : > { %v3435_v39 = vadd.f32 %v4028_v35, %v4957_v38  ;;  %v3425_v41 = vpop.f32.mrb[25].mxu0 }
0x1331   : > { %v3434_v42 = vadd.f32 %v3425_v41, %v4954_v36 }
0x1332   : > { %3437 = vst.msk [vmem:[#allocation2 + $0x8] sm:$0xff] %vm419_vm1, %v3435_v39  ;;  %3443 = vst.msk [vmem:[#allocation6 + $0x8] sm:$0xff] (!%p3633_p8), %vm419_vm1, %v3435_v39 }
0x1333   : > { %3436 = vst.msk [vmem:[#allocation2] sm:$0xff] %vm419_vm1, %v3434_v42  ;;  %3442 = vst.msk [vmem:[#allocation6] sm:$0xff] (!%p3633_p8), %vm419_vm1, %v3434_v42 }
0x1334 PF: > { %p4204_p4 = scmp.eq.s32.totalorder %s4556_s9, 1  ;;  %s4489_s12 = smov [#allocation6]  }
0x1335   : > { %s3450_s16 = sshll.u32 %s4489_s12, 4  ;;  %s3451_s16 = int_to_ptr.vmem [resolvable:$true] %s3450_s16 }
0x1336   : > { %s4417_s18 = scalar_lea.vmem %s3451_s16, 256  ;;  %p4424_p12 = scmp.lt.s32.totalorder %s3451_s16, %s3451_s16 }
0x1337   : > { %p4418_p5 = scmp.ne.s32.totalorder %s3451_s16, %s4417_s18  ;;  %p4425_p0 = scmp.lt.s32.totalorder %s4417_s18, %s4417_s18 }
0x1339   : > { %p4419_p6 = pnand %p4418_p5, %p4204_p4  ;;  %p4426_p1 = por %p4425_p0, %p4424_p12 }
0x133b   : > { %p4420_p10 = pneg %p4419_p6 }
0x133d   : > { %p4427_p2 = pnand %p4426_p1, %p4420_p10 }
0x133f   : > { %4430 = shalt.err (!%p4427_p2)
}
0x1340   : > { %s4431_s30 = scalar_lea.hbm %s5035_s8, 256 }
0x1341   : > { %p4432_p11 = scmp.ne.s32.totalorder %s5035_s8, %s4431_s30  ;;  %p4437_p9 = scmp.lt.u32.totalorder %s4431_s30, %s5035_s8 }
0x1343   : > { %p4433_p13 = pnand %p4432_p11, %p4204_p4 }
0x1345   : > { %p4434_p3 = pneg %p4433_p13 }
0x1347   : > { %p4439_p7 = pnand %p4437_p9, %p4434_p3 }
0x1349   : > { %4442 = shalt.err (!%p4439_p7)
}
0x134a   : > { %s4490_s14 = smov 128   ;;  %s4491_s26 = smov 8  }
0x134b   : > { %4196 = dma.vmem_to_hbm [thread:$0]  (%p4204_p4), %s3451_s16, 256, %s5035_s8, [#allocation5], %s4490_s14, %s4490_s14, %s4491_s26  }
0x134c   : > { %4464 = dma.done.wait (%p4204_p4), [#allocation5], 256  }
0x134d   : > { %4466 = vsyncadd (%p4204_p4), [#allocation5], 4294967040 }
0x134e PF: > { %p19_p8 = scmp.ge.s32.totalorder %s4559_s10, 4   ;;  %s5041_s27 = smov %s4473_s28 }
0x134f   : > { %s5042_s28 = smov %s4477_s29  ;;  %s5043_s29 = smov %s4569_s13 }
0x1350   : > { %s5044_s30 = smov %s4559_s10  ;;  %21 = sbr.rel (!%p19_p8) target bundleno = 4 (0x4), region = 106 }
0x1357   :  { %3466 = vsyncpa [#allocation4], 1 }
0x1358   :  { %3468 = vsyncpa [#allocation4 + $0x1], 1 }
0x1359   :  { %3469 = vsyncpa [#allocation5], 1 }
0x135a   :  { %3471 = vsyncpa [#allocation5 + $0x1], 1 }

</bundles_post_ra>
